<compile_context>
chip_gen: v6e
topology: v6e:2x2x1
jax: 0.10.0
libtpu: 0.0.40
codegen_flags: <defaults>
</compile_context>

<pallas_src>
import jax
import jax.numpy as jnp
from jax.experimental import pallas as pl
from jax.experimental.pallas import tpu as pltpu

INPUT_SIZE = 32
HIDDEN = [64, 128, 256, 128, 64, 32, 1]   # layer output dims (last has no ReLU)


def growthnn_kernel(x_ref,
                    w1, b1, w2, b2, w3, b3, w4, b4, w5, b5, w6, b6, w7, b7,
                    o_ref):
    """Fused MLP forward on one batch tile. All weights stay resident in VMEM."""
    h = x_ref[...]                                   # (tile_b, 32) bf16

    def dense_relu(h, w_ref, b_ref):
        # bf16 operands into the MXU, f32 accumulation; bias + ReLU in f32,
        # then pack the stored activation back to bf16 (same values reach the
        # next matmul as before, half the inter-layer data volume).
        y = jnp.dot(h, w_ref[...], preferred_element_type=jnp.float32) + b_ref[...]
        return jnp.maximum(y, 0.0).astype(jnp.bfloat16)

    h = dense_relu(h, w1, b1)
    h = dense_relu(h, w2, b2)
    h = dense_relu(h, w3, b3)
    h = dense_relu(h, w4, b4)
    h = dense_relu(h, w5, b5)
    h = dense_relu(h, w6, b6)                        # (tile_b, 32) bf16

    # Final 32 -> 1 layer: VPU multiply + sublane reduce (XLU/VPU slots are
    # otherwise idle) instead of an N=1 MXU matmul. Transpose in bf16 (half
    # the vxpose work); math in f32 against the f32 w7/b7. Result is produced
    # directly as a lane-dense (1, tile_b) row.
    hT = h.T                                         # (32, tile_b) bf16
    y = jnp.sum(hT.astype(jnp.float32) * w7[...], axis=0, keepdims=True) + b7[...]
    o_ref[...] = y[None].astype(o_ref.dtype)         # (1, 1, tile_b)


def growthnn_forward(x, params, *, tile_b=1024):
    """x: (B, input_size) float32.  params: list of (W, b), W (in, out), b (1, out)."""
    B, D = x.shape
    assert tile_b % 128 == 0, "tile_b must be a multiple of 128 (lane-aligned tiles)"

    def round_up(v, m):
        return ((v + m - 1) // m) * m

    # Large tiles amortize the ~0.35us/step pipeline overhead; but keep at
    # least 2 grid steps when the batch allows it so v7x's two TensorCores
    # both get work. For tiny batches this degenerates to a single 128-row tile.
    eff_tile = min(tile_b, max(128, round_up((B + 1) // 2, 128)))
    num_tiles = pl.cdiv(B, eff_tile)
    b_pad = num_tiles * eff_tile

    # x is fed to the MXU in bf16 anyway -> cast once here (halves the only
    # per-step HBM input stream) and pad ragged batches (padded rows are
    # computed then sliced off below).
    x = x.astype(jnp.bfloat16)
    if b_pad != B:
        x = jnp.pad(x, ((0, b_pad - B), (0, 0)))

    # Weights of the matmul layers in bf16 (MXU inputs); biases and the final
    # 32->1 weight column stay f32 (used on the VPU).
    n_layers = len(params)
    flat, param_specs = [], []
    for idx, (w, b) in enumerate(params):
        w_c = w.astype(jnp.bfloat16) if idx < n_layers - 1 else w.astype(jnp.float32)
        b_c = b.astype(jnp.float32)
        flat.extend([w_c, b_c])
        # Constant index maps -> each param is DMA'd once and stays resident.
        # (pl.Buffered(1) on these would also drop the unused second buffers;
        # skipped as a minor-hygiene item to keep the lowering conservative.)
        param_specs.append(pl.BlockSpec(w.shape, lambda i: (0, 0)))
        param_specs.append(pl.BlockSpec(b.shape, lambda i: (0, 0)))

    x_spec = pl.BlockSpec((eff_tile, D), lambda i: (i, 0))
    out_spec = pl.BlockSpec((1, 1, eff_tile), lambda i: (i, 0, 0))

    macs = sum(int(w.shape[0]) * int(w.shape[1]) for w, _ in params)
    param_bytes = sum(int(a.size) * a.dtype.itemsize for a in flat)
    cost = pl.CostEstimate(
        flops=2 * b_pad * macs,
        transcendentals=0,
        bytes_accessed=b_pad * D * 2 + b_pad * 4 + param_bytes,
    )

    out3 = pl.pallas_call(
        growthnn_kernel,
        out_shape=jax.ShapeDtypeStruct((num_tiles, 1, eff_tile), jnp.float32),
        grid_spec=pltpu.PrefetchScalarGridSpec(
            num_scalar_prefetch=0,
            grid=(num_tiles,),
            in_specs=[x_spec] + param_specs,
            out_specs=out_spec,
        ),
        compiler_params=pltpu.CompilerParams(
            dimension_semantics=("parallel",)),
        cost_estimate=cost,
    )(x, *flat)

    # (num_tiles, 1, eff_tile) -> (B, 1)
    return out3.reshape(-1, 1)[:B]


def init_params(key, input_size):
    """Deterministic synthetic init (PyTorch-style uniform fan-in scaling)."""
    dims = [input_size] + HIDDEN
    params = []
    for i in range(len(HIDDEN)):
        key, kw, kb = jax.random.split(key, 3)
        scale = 1.0 / jnp.sqrt(jnp.float32(dims[i]))
        w = jax.random.uniform(kw, (dims[i], dims[i + 1]), jnp.float32,
                               minval=-scale, maxval=scale)
        b = jax.random.uniform(kb, (1, dims[i + 1]), jnp.float32,
                               minval=-scale, maxval=scale)
        params.append((w, b))
    return params


def reference_forward(x, params):
    h = x
    for i, (w, b) in enumerate(params):
        h = h @ w + b
        if i < len(params) - 1:
            h = jnp.maximum(h, 0.0)
    return h


if __name__ == "__main__":
    key = jax.random.PRNGKey(0)
    key, kx = jax.random.split(key)

    # Ragged batch (not a multiple of the tile) exercising padding and a
    # 2-step parallel grid (400 rows -> eff_tile=256, 2 tiles, 512 padded rows).
    B = 400
    x = jax.random.normal(kx, (B, INPUT_SIZE), jnp.float32)
    params = init_params(key, INPUT_SIZE)

    out = growthnn_forward(x, params, tile_b=1024)
    out = jax.block_until_ready(out)

    ref = reference_forward(x, params)
    assert out.shape == (B, 1), out.shape
    # bf16 matmul inputs/activations (f32 accumulation) -> relaxed tolerance
    # vs the f32 reference.
    assert jnp.allclose(out, ref, atol=5e-2, rtol=5e-2), \
        f"max err {jnp.max(jnp.abs(out - ref))}"

    print("KERNEL_OK")
</pallas_src>

<mosaic_0001>
module attributes {stable_mosaic.version = 11 : i64} {
  func.func @growthnn_kernel(%arg0: i32, %arg1: memref<256x32xbf16, #tpu.memory_space<vmem>>, %arg2: memref<32x64xbf16, #tpu.memory_space<vmem>>, %arg3: memref<1x64xf32, #tpu.memory_space<vmem>>, %arg4: memref<64x128xbf16, #tpu.memory_space<vmem>>, %arg5: memref<1x128xf32, #tpu.memory_space<vmem>>, %arg6: memref<128x256xbf16, #tpu.memory_space<vmem>>, %arg7: memref<1x256xf32, #tpu.memory_space<vmem>>, %arg8: memref<256x128xbf16, #tpu.memory_space<vmem>>, %arg9: memref<1x128xf32, #tpu.memory_space<vmem>>, %arg10: memref<128x64xbf16, #tpu.memory_space<vmem>>, %arg11: memref<1x64xf32, #tpu.memory_space<vmem>>, %arg12: memref<64x32xbf16, #tpu.memory_space<vmem>>, %arg13: memref<1x32xf32, #tpu.memory_space<vmem>>, %arg14: memref<32x1xf32, #tpu.memory_space<vmem>>, %arg15: memref<1x1xf32, #tpu.memory_space<vmem>>, %arg16: memref<1x1x256xf32, #tpu.memory_space<vmem>>) attributes {dimension_semantics = [#tpu.dimension_semantics<parallel>], iteration_bounds = array<i64: 2>, scalar_prefetch = 0 : i64, scratch_operands = 0 : i64, tpu.core_type = #tpu.core_type<tc>, window_params = [{transform_indices = @transform_0, window_bounds = array<i64: 256, 32>}, {pipeline_mode = #tpu.pipeline_mode<synchronous>, transform_indices = @transform_1, window_bounds = array<i64: 32, 64>}, {pipeline_mode = #tpu.pipeline_mode<synchronous>, transform_indices = @transform_2, window_bounds = array<i64: 1, 64>}, {pipeline_mode = #tpu.pipeline_mode<synchronous>, transform_indices = @transform_3, window_bounds = array<i64: 64, 128>}, {pipeline_mode = #tpu.pipeline_mode<synchronous>, transform_indices = @transform_4, window_bounds = array<i64: 1, 128>}, {pipeline_mode = #tpu.pipeline_mode<synchronous>, transform_indices = @transform_5, window_bounds = array<i64: 128, 256>}, {pipeline_mode = #tpu.pipeline_mode<synchronous>, transform_indices = @transform_6, window_bounds = array<i64: 1, 256>}, {pipeline_mode = #tpu.pipeline_mode<synchronous>, transform_indices = @transform_7, window_bounds = array<i64: 256, 128>}, {pipeline_mode = #tpu.pipeline_mode<synchronous>, transform_indices = @transform_8, window_bounds = array<i64: 1, 128>}, {pipeline_mode = #tpu.pipeline_mode<synchronous>, transform_indices = @transform_9, window_bounds = array<i64: 128, 64>}, {pipeline_mode = #tpu.pipeline_mode<synchronous>, transform_indices = @transform_10, window_bounds = array<i64: 1, 64>}, {pipeline_mode = #tpu.pipeline_mode<synchronous>, transform_indices = @transform_11, window_bounds = array<i64: 64, 32>}, {pipeline_mode = #tpu.pipeline_mode<synchronous>, transform_indices = @transform_12, window_bounds = array<i64: 1, 32>}, {pipeline_mode = #tpu.pipeline_mode<synchronous>, transform_indices = @transform_13, window_bounds = array<i64: 32, 1>}, {pipeline_mode = #tpu.pipeline_mode<synchronous>, transform_indices = @transform_14, window_bounds = array<i64: 1, 1>}, {transform_indices = @transform_15, window_bounds = array<i64: 1, 1, 256>}]} {
    %c0 = arith.constant 0 : index
    %c0_0 = arith.constant 0 : index
    %0 = vector.load %arg1[%c0, %c0_0] : memref<256x32xbf16, #tpu.memory_space<vmem>>, vector<256x32xbf16>
    %c0_1 = arith.constant 0 : index
    %c0_2 = arith.constant 0 : index
    %1 = vector.load %arg2[%c0_1, %c0_2] : memref<32x64xbf16, #tpu.memory_space<vmem>>, vector<32x64xbf16>
    %cst = arith.constant dense<0.000000e+00> : vector<256x64xf32>
    %2 = tpu.matmul %0, %1, %cst {dimension_numbers = #tpu.dot_dimension_numbers<[1], [0], [0], [1], [0, 0, 1, 1], [], []>} : vector<256x32xbf16>, vector<32x64xbf16>, vector<256x64xf32> -> vector<256x64xf32>
    %c0_3 = arith.constant 0 : index
    %c0_4 = arith.constant 0 : index
    %3 = vector.load %arg3[%c0_3, %c0_4] : memref<1x64xf32, #tpu.memory_space<vmem>>, vector<1x64xf32>
    %4 = vector.broadcast %3 : vector<1x64xf32> to vector<256x64xf32>
    %5 = arith.addf %2, %4 : vector<256x64xf32>
    %cst_5 = arith.constant 0.000000e+00 : f32
    %6 = vector.broadcast %cst_5 : f32 to vector<256x64xf32>
    %7 = arith.maximumf %5, %6 : vector<256x64xf32>
    %8 = arith.truncf %7 : vector<256x64xf32> to vector<256x64xbf16>
    %c0_6 = arith.constant 0 : index
    %c0_7 = arith.constant 0 : index
    %9 = vector.load %arg4[%c0_6, %c0_7] : memref<64x128xbf16, #tpu.memory_space<vmem>>, vector<64x128xbf16>
    %cst_8 = arith.constant dense<0.000000e+00> : vector<256x128xf32>
    %10 = tpu.matmul %8, %9, %cst_8 {dimension_numbers = #tpu.dot_dimension_numbers<[1], [0], [0], [1], [0, 0, 1, 1], [], []>} : vector<256x64xbf16>, vector<64x128xbf16>, vector<256x128xf32> -> vector<256x128xf32>
    %c0_9 = arith.constant 0 : index
    %c0_10 = arith.constant 0 : index
    %11 = vector.load %arg5[%c0_9, %c0_10] : memref<1x128xf32, #tpu.memory_space<vmem>>, vector<1x128xf32>
    %12 = vector.broadcast %11 : vector<1x128xf32> to vector<256x128xf32>
    %13 = arith.addf %10, %12 : vector<256x128xf32>
    %cst_11 = arith.constant 0.000000e+00 : f32
    %14 = vector.broadcast %cst_11 : f32 to vector<256x128xf32>
    %15 = arith.maximumf %13, %14 : vector<256x128xf32>
    %16 = arith.truncf %15 : vector<256x128xf32> to vector<256x128xbf16>
    %c0_12 = arith.constant 0 : index
    %c0_13 = arith.constant 0 : index
    %17 = vector.load %arg6[%c0_12, %c0_13] : memref<128x256xbf16, #tpu.memory_space<vmem>>, vector<128x256xbf16>
    %cst_14 = arith.constant dense<0.000000e+00> : vector<256x256xf32>
    %18 = tpu.matmul %16, %17, %cst_14 {dimension_numbers = #tpu.dot_dimension_numbers<[1], [0], [0], [1], [0, 0, 1, 1], [], []>} : vector<256x128xbf16>, vector<128x256xbf16>, vector<256x256xf32> -> vector<256x256xf32>
    %c0_15 = arith.constant 0 : index
    %c0_16 = arith.constant 0 : index
    %19 = vector.load %arg7[%c0_15, %c0_16] : memref<1x256xf32, #tpu.memory_space<vmem>>, vector<1x256xf32>
    %20 = vector.broadcast %19 : vector<1x256xf32> to vector<256x256xf32>
    %21 = arith.addf %18, %20 : vector<256x256xf32>
    %cst_17 = arith.constant 0.000000e+00 : f32
    %22 = vector.broadcast %cst_17 : f32 to vector<256x256xf32>
    %23 = arith.maximumf %21, %22 : vector<256x256xf32>
    %24 = arith.truncf %23 : vector<256x256xf32> to vector<256x256xbf16>
    %c0_18 = arith.constant 0 : index
    %c0_19 = arith.constant 0 : index
    %25 = vector.load %arg8[%c0_18, %c0_19] : memref<256x128xbf16, #tpu.memory_space<vmem>>, vector<256x128xbf16>
    %cst_20 = arith.constant dense<0.000000e+00> : vector<256x128xf32>
    %26 = tpu.matmul %24, %25, %cst_20 {dimension_numbers = #tpu.dot_dimension_numbers<[1], [0], [0], [1], [0, 0, 1, 1], [], []>} : vector<256x256xbf16>, vector<256x128xbf16>, vector<256x128xf32> -> vector<256x128xf32>
    %c0_21 = arith.constant 0 : index
    %c0_22 = arith.constant 0 : index
    %27 = vector.load %arg9[%c0_21, %c0_22] : memref<1x128xf32, #tpu.memory_space<vmem>>, vector<1x128xf32>
    %28 = vector.broadcast %27 : vector<1x128xf32> to vector<256x128xf32>
    %29 = arith.addf %26, %28 : vector<256x128xf32>
    %cst_23 = arith.constant 0.000000e+00 : f32
    %30 = vector.broadcast %cst_23 : f32 to vector<256x128xf32>
    %31 = arith.maximumf %29, %30 : vector<256x128xf32>
    %32 = arith.truncf %31 : vector<256x128xf32> to vector<256x128xbf16>
    %c0_24 = arith.constant 0 : index
    %c0_25 = arith.constant 0 : index
    %33 = vector.load %arg10[%c0_24, %c0_25] : memref<128x64xbf16, #tpu.memory_space<vmem>>, vector<128x64xbf16>
    %cst_26 = arith.constant dense<0.000000e+00> : vector<256x64xf32>
    %34 = tpu.matmul %32, %33, %cst_26 {dimension_numbers = #tpu.dot_dimension_numbers<[1], [0], [0], [1], [0, 0, 1, 1], [], []>} : vector<256x128xbf16>, vector<128x64xbf16>, vector<256x64xf32> -> vector<256x64xf32>
    %c0_27 = arith.constant 0 : index
    %c0_28 = arith.constant 0 : index
    %35 = vector.load %arg11[%c0_27, %c0_28] : memref<1x64xf32, #tpu.memory_space<vmem>>, vector<1x64xf32>
    %36 = vector.broadcast %35 : vector<1x64xf32> to vector<256x64xf32>
    %37 = arith.addf %34, %36 : vector<256x64xf32>
    %cst_29 = arith.constant 0.000000e+00 : f32
    %38 = vector.broadcast %cst_29 : f32 to vector<256x64xf32>
    %39 = arith.maximumf %37, %38 : vector<256x64xf32>
    %40 = arith.truncf %39 : vector<256x64xf32> to vector<256x64xbf16>
    %c0_30 = arith.constant 0 : index
    %c0_31 = arith.constant 0 : index
    %41 = vector.load %arg12[%c0_30, %c0_31] : memref<64x32xbf16, #tpu.memory_space<vmem>>, vector<64x32xbf16>
    %cst_32 = arith.constant dense<0.000000e+00> : vector<256x32xf32>
    %42 = tpu.matmul %40, %41, %cst_32 {dimension_numbers = #tpu.dot_dimension_numbers<[1], [0], [0], [1], [0, 0, 1, 1], [], []>} : vector<256x64xbf16>, vector<64x32xbf16>, vector<256x32xf32> -> vector<256x32xf32>
    %c0_33 = arith.constant 0 : index
    %c0_34 = arith.constant 0 : index
    %43 = vector.load %arg13[%c0_33, %c0_34] : memref<1x32xf32, #tpu.memory_space<vmem>>, vector<1x32xf32>
    %44 = vector.broadcast %43 : vector<1x32xf32> to vector<256x32xf32>
    %45 = arith.addf %42, %44 : vector<256x32xf32>
    %cst_35 = arith.constant 0.000000e+00 : f32
    %46 = vector.broadcast %cst_35 : f32 to vector<256x32xf32>
    %47 = arith.maximumf %45, %46 : vector<256x32xf32>
    %48 = arith.truncf %47 : vector<256x32xf32> to vector<256x32xbf16>
    %49 = tpu.transpose %48, [1, 0] : vector<256x32xbf16> -> vector<32x256xbf16>
    %50 = arith.extf %49 : vector<32x256xbf16> to vector<32x256xf32>
    %c0_36 = arith.constant 0 : index
    %c0_37 = arith.constant 0 : index
    %51 = vector.load %arg14[%c0_36, %c0_37] : memref<32x1xf32, #tpu.memory_space<vmem>>, vector<32x1xf32>
    %52 = vector.broadcast %51 : vector<32x1xf32> to vector<32x256xf32>
    %53 = arith.mulf %50, %52 : vector<32x256xf32>
    %cst_38 = arith.constant dense<0.000000e+00> : vector<256xf32>
    %54 = vector.multi_reduction <add>, %53, %cst_38 [0] : vector<32x256xf32> to vector<256xf32>
    %55 = vector.shape_cast %54 : vector<256xf32> to vector<1x256xf32>
    %c0_39 = arith.constant 0 : index
    %c0_40 = arith.constant 0 : index
    %56 = vector.load %arg15[%c0_39, %c0_40] : memref<1x1xf32, #tpu.memory_space<vmem>>, vector<1x1xf32>
    %57 = vector.broadcast %56 : vector<1x1xf32> to vector<1x256xf32>
    %58 = arith.addf %55, %57 : vector<1x256xf32>
    %59 = vector.shape_cast %58 : vector<1x256xf32> to vector<1x1x256xf32>
    %c0_41 = arith.constant 0 : index
    %c0_42 = arith.constant 0 : index
    %c0_43 = arith.constant 0 : index
    %60 = vector.load %arg16[%c0_41, %c0_42, %c0_43] : memref<1x1x256xf32, #tpu.memory_space<vmem>>, vector<1x1x256xf32>
    tpu.vector_store %arg16[%c0_41, %c0_42, %c0_43], %59 {strides = array<i32>} : memref<1x1x256xf32, #tpu.memory_space<vmem>>, vector<1x1x256xf32>,
    return
  }
  func.func @transform_0(%arg0: i32) -> (i32, i32) {
    %c0_i32 = arith.constant 0 : i32
    %c0_i32_0 = arith.constant 0 : i32
    return %arg0, %c0_i32 : i32, i32
  }
  func.func @transform_1(%arg0: i32) -> (i32, i32) {
    %c0_i32 = arith.constant 0 : i32
    %c0_i32_0 = arith.constant 0 : i32
    %c0_i32_1 = arith.constant 0 : i32
    return %c0_i32, %c0_i32_0 : i32, i32
  }
  func.func @transform_2(%arg0: i32) -> (i32, i32) {
    %c0_i32 = arith.constant 0 : i32
    %c0_i32_0 = arith.constant 0 : i32
    %c0_i32_1 = arith.constant 0 : i32
    return %c0_i32, %c0_i32_0 : i32, i32
  }
  func.func @transform_3(%arg0: i32) -> (i32, i32) {
    %c0_i32 = arith.constant 0 : i32
    %c0_i32_0 = arith.constant 0 : i32
    %c0_i32_1 = arith.constant 0 : i32
    return %c0_i32, %c0_i32_0 : i32, i32
  }
  func.func @transform_4(%arg0: i32) -> (i32, i32) {
    %c0_i32 = arith.constant 0 : i32
    %c0_i32_0 = arith.constant 0 : i32
    %c0_i32_1 = arith.constant 0 : i32
    return %c0_i32, %c0_i32_0 : i32, i32
  }
  func.func @transform_5(%arg0: i32) -> (i32, i32) {
    %c0_i32 = arith.constant 0 : i32
    %c0_i32_0 = arith.constant 0 : i32
    %c0_i32_1 = arith.constant 0 : i32
    return %c0_i32, %c0_i32_0 : i32, i32
  }
  func.func @transform_6(%arg0: i32) -> (i32, i32) {
    %c0_i32 = arith.constant 0 : i32
    %c0_i32_0 = arith.constant 0 : i32
    %c0_i32_1 = arith.constant 0 : i32
    return %c0_i32, %c0_i32_0 : i32, i32
  }
  func.func @transform_7(%arg0: i32) -> (i32, i32) {
    %c0_i32 = arith.constant 0 : i32
    %c0_i32_0 = arith.constant 0 : i32
    %c0_i32_1 = arith.constant 0 : i32
    return %c0_i32, %c0_i32_0 : i32, i32
  }
  func.func @transform_8(%arg0: i32) -> (i32, i32) {
    %c0_i32 = arith.constant 0 : i32
    %c0_i32_0 = arith.constant 0 : i32
    %c0_i32_1 = arith.constant 0 : i32
    return %c0_i32, %c0_i32_0 : i32, i32
  }
  func.func @transform_9(%arg0: i32) -> (i32, i32) {
    %c0_i32 = arith.constant 0 : i32
    %c0_i32_0 = arith.constant 0 : i32
    %c0_i32_1 = arith.constant 0 : i32
    return %c0_i32, %c0_i32_0 : i32, i32
  }
  func.func @transform_10(%arg0: i32) -> (i32, i32) {
    %c0_i32 = arith.constant 0 : i32
    %c0_i32_0 = arith.constant 0 : i32
    %c0_i32_1 = arith.constant 0 : i32
    return %c0_i32, %c0_i32_0 : i32, i32
  }
  func.func @transform_11(%arg0: i32) -> (i32, i32) {
    %c0_i32 = arith.constant 0 : i32
    %c0_i32_0 = arith.constant 0 : i32
    %c0_i32_1 = arith.constant 0 : i32
    return %c0_i32, %c0_i32_0 : i32, i32
  }
  func.func @transform_12(%arg0: i32) -> (i32, i32) {
    %c0_i32 = arith.constant 0 : i32
    %c0_i32_0 = arith.constant 0 : i32
    %c0_i32_1 = arith.constant 0 : i32
    return %c0_i32, %c0_i32_0 : i32, i32
  }
  func.func @transform_13(%arg0: i32) -> (i32, i32) {
    %c0_i32 = arith.constant 0 : i32
    %c0_i32_0 = arith.constant 0 : i32
    %c0_i32_1 = arith.constant 0 : i32
    return %c0_i32, %c0_i32_0 : i32, i32
  }
  func.func @transform_14(%arg0: i32) -> (i32, i32) {
    %c0_i32 = arith.constant 0 : i32
    %c0_i32_0 = arith.constant 0 : i32
    %c0_i32_1 = arith.constant 0 : i32
    return %c0_i32, %c0_i32_0 : i32, i32
  }
  func.func @transform_15(%arg0: i32) -> (i32, i32, i32) {
    %c0_i32 = arith.constant 0 : i32
    %c0_i32_0 = arith.constant 0 : i32
    %c0_i32_1 = arith.constant 0 : i32
    return %arg0, %c0_i32, %c0_i32_0 : i32, i32, i32
  }
}

</mosaic_0001>

<bundles_post_ra>
// kernel: tpu_custom_call.1
= control target key start
LH: loop header
LB: loop body
LE: loop exit
PB: predicated region body
PF: predicated region fallthrough
CT: control target
= control target key end

     0   :  { %s4058_s0 = inlined_call_operand.vmem [shape: bf16[512,32], index: 0, kind: input, shape index: {}]   ;;  %s4059_s1 = inlined_call_operand.vmem [shape: bf16[32,64], index: 1, kind: input, shape index: {}]   ;;  %s4060_s2 = inlined_call_operand.vmem [shape: f32[1,64], index: 2, kind: input, shape index: {}]   ;;  %s4061_s3 = inlined_call_operand.vmem [shape: bf16[64,128], index: 3, kind: input, shape index: {}]   ;;  %s4062_s4 = inlined_call_operand.vmem [shape: f32[1,128], index: 4, kind: input, shape index: {}]   ;;  %s4063_s5 = inlined_call_operand.vmem [shape: bf16[128,256], index: 5, kind: input, shape index: {}]   ;;  %s4064_s6 = inlined_call_operand.vmem [shape: f32[1,256], index: 6, kind: input, shape index: {}]   ;;  %s4065_s7 = inlined_call_operand.vmem [shape: bf16[256,128], index: 7, kind: input, shape index: {}]   ;;  %s4066_s8 = inlined_call_operand.vmem [shape: f32[1,128], index: 8, kind: input, shape index: {}]   ;;  %s4067_s9 = inlined_call_operand.vmem [shape: bf16[128,64], index: 9, kind: input, shape index: {}]   ;;  %s4068_s10 = inlined_call_operand.vmem [shape: f32[1,64], index: 10, kind: input, shape index: {}]   ;;  %s4069_s11 = inlined_call_operand.vmem [shape: bf16[64,32], index: 11, kind: input, shape index: {}]   ;;  %s4070_s12 = inlined_call_operand.vmem [shape: f32[1,32], index: 12, kind: input, shape index: {}]   ;;  %s4071_s13 = inlined_call_operand.vmem [shape: f32[32,1], index: 13, kind: input, shape index: {}]   ;;  %s4072_s14 = inlined_call_operand.<no memory space> [shape: f32[1,1], index: 14, kind: input, shape index: {}]   ;;  %s4073_s15 = inlined_call_operand.hbm [shape: f32[2,1,256], index: 15, kind: output, shape index: {}]  }
   0x1   :  { %4075 = sst [smem:[#allocation8_spill]] %s4058_s0  ;;  %v20_v0 = vstv %s4072_s14 }
   0x2   :  { %4076 = sst [smem:[#allocation9_spill]] %s4059_s1  ;;  %21 = vst [vmem:[#allocation2] sm:$0x1] %v20_v0 }
   0x3   :  { %4077 = sst [smem:[#allocation10_spill]] %s4060_s2 }
   0x4   :  { %22 = vsyncpa [#allocation4], 0 }
   0x5   :  { %24 = vsyncpa [#allocation4 + $0x1], 0  ;;  %s3459_s20 = smov 0   ;;  %s3461_s21 = smov 0  }
   0x6   :  { %s3463_s22 = smov 0   ;;  %s3465_s23 = smov 0  }
   0x7 LB: > { %4078 = sst [smem:[#allocation6_spill]] %s3367_s22  ;;  %s2703_s14 = sadd.s32 4294967295, %s3371_s23   ;;  %s3371_s23 = sphi %s3465_s23, %s4089_s23   ;;  %s3367_s22 = sphi %s3463_s22, %s4086_s22   ;;  %s3363_s21 = sphi %s3461_s21, %s4088_s21   ;;  %s3359_s20 = sphi %s3459_s20, %s4087_s20  }
   0x8   : > { %s2704_s24 = sadd.s32 4294967294, %s3371_s23   ;;  %s3482_s25 = sadd.s32 1, %s3371_s23  }
   0x9   : > { %s357_s26 = sadd.s32 1, %s3367_s22  ;;  %s354_s27 = ssub.s32 %s3371_s23, %s3482_s25 }
   0xa   : > { %p367_p0 = scmp.ne.s32.totalorder %s3367_s22, %s3363_s21  ;;  %p355_p1 = scmp.eq.s32.totalorder %s354_s27, 0 }
   0xb   : > { %p368_p2 = scmp.eq.s32.totalorder %s2703_s14, 1  ;;  %p373_p3 = scmp.ne.s32.totalorder %s3363_s21, %s3359_s20 }
   0xc   : > { %p374_p4 = scmp.eq.s32.totalorder %s2704_s24, 1  ;;  %p2707_p7 = scmp.ge.s32.totalorder %s3371_s23, 1 }
   0xd   : > { %s3492_s28 = scalar_select %p355_p1, %s3367_s22, %s357_s26  }
   0xe   : > { %p3494_p5 = por %p368_p2, %p367_p0  ;;  %p3498_p6 = por %p374_p4, %p373_p3 }
   0xf   : > { %4079 = sst [smem:[#allocation7_spill]] %s3492_s28  ;;  %p443_p8 = scmp.lt.s32.totalorder %s3371_s23, 3 }
  0x11   : > { %p444_p9 = pnand %p2707_p7, %p443_p8 }
  0x12   : > { %s4082_s1 = sld [smem:[#allocation9_spill]] (!%p444_p9)  ;;  %s3507_s18 = sshll.u32 (!%p444_p9), %s2703_s14, 5 }
  0x13   : > { %447 = sbr.rel (%p444_p9) target bundleno = 1508 (0x5e4), region = 80  ;;  %p492_p10 = scmp.lt.s32.totalorder (!%p444_p9), %s3507_s18, 63 }
  0x14   : > { %s4083_s0 = sld [smem:[#allocation8_spill]] (!%p444_p9)  ;;  %s488_s27 = sand.u32 (!%p444_p9), 1, %s3363_s21  }
  0x15   : > { %s4084_s2 = sld [smem:[#allocation10_spill]] (!%p444_p9)  ;;  %s2631_s19 = scalar_lea.sflag (!%p444_p9), [#allocation4], %s488_s27 }
  0x16   : > { %s3375_s26 = smov (!%p444_p9), [#allocation3]  }
  0x18   : > { %v3237_v1 = vld [vmem:[%s4082_s1 + $0x8] sm:$0xff]   ;;  %v3238_v2 = vld [vmem:[%s4082_s1] sm:$0xff]   ;;  %v3255_v3 = vld [vmem:[%s4061_s3 + $0x18] sm:$0xff]   ;;  %s493_s28 = scalar_select %p492_p10, %s3507_s18, 63  ;;  %vm633_vm0 = vcmask 261120   ;;  %vm930_vm1 = vcmask 523264  }
  0x19   : > { %3030 = vmatprep.subr.bf16.mxu0 %v3237_v1  ;;  %3066 = vmatprep.subr.bf16.mxu1 %v3255_v3  ;;  %v3256_v20 = vld [vmem:[%s4061_s3 + $0x10] sm:$0xff]   ;;  %v3257_v21 = vld [vmem:[%s4061_s3 + $0x8] sm:$0xff]   ;;  %v3258_v22 = vld [vmem:[%s4061_s3] sm:$0xff]   ;;  %s3315_s1 = sshll.u32 %s3375_s26, 4  ;;  %s3316_s1 = int_to_ptr.vmem [resolvable:$false] %s3315_s1 }
  0x1a   : > { %3031 = vmatpush3.bf16.msra.mxu0 %v3237_v1  ;;  %s2710_s16 = sshll.u32 %s493_s28, 2  ;;  %3067 = vmatpush3.bf16.msra.mxu1 %v3255_v3  ;;  %v3259_v23 = vld [vmem:[%s4063_s5 + $0x70] ss:$8 sps:$4 sm:$0xff]   ;;  %v3261_v24 = vld [vmem:[%s4063_s5 + $0x74] ss:$8 sps:$4 sm:$0xff]   ;;  %s2643_s28 = scalar_lea.hbm %s4073_s15, %s3507_s18 }
  0x1b   : > { %3032 = vmatprep.subr.bf16.mxu0 %v3238_v2  ;;  %s3520_s22 = scalar_lea.vmem %s4083_s0, %s2710_s16  ;;  %3068 = vmatprep.subr.bf16.mxu1 %v3256_v20  ;;  %v3264_v25 = vld [vmem:[%s4063_s5 + $0x64] ss:$8 sps:$4 sm:$0xff]   ;;  %v3262_v26 = vld [vmem:[%s4063_s5 + $0x60] ss:$8 sps:$4 sm:$0xff]   ;;  %v3267_v27 = vld [vmem:[%s4063_s5 + $0x54] ss:$8 sps:$4 sm:$0xff]  }
  0x1c   : > { %v3239_v4 = vld [vmem:[%s3520_s22] sm:$0xff]   ;;  %v3240_v5 = vld [vmem:[%s3520_s22 + $0x8] sm:$0xff]   ;;  %v3241_v6 = vld [vmem:[%s3520_s22 + $0x10] sm:$0xff]   ;;  %s2708_s16 = sshll.u32 %s488_s27, 1 }
  0x1d   : > { %3034 = vmatprep.mubr.msk.bf16.mxu0 %vm633_vm0, %v3239_v4  ;;  %v3242_v7 = vld [vmem:[%s3520_s22 + $0x18] sm:$0xff]   ;;  %v3243_v8 = vld [vmem:[%s3520_s22 + $0x20] sm:$0xff]   ;;  %v3244_v9 = vld [vmem:[%s3520_s22 + $0x28] sm:$0xff]  }
  0x1e   : > { %3033 = vmatpush3.bf16.msra.mxu0 %v3238_v2  ;;  %v3245_v10 = vld [vmem:[%s3520_s22 + $0x30] sm:$0xff]   ;;  %v3246_v11 = vld [vmem:[%s3520_s22 + $0x38] sm:$0xff]   ;;  %v3247_v12 = vld [vmem:[%s3520_s22 + $0x40] sm:$0xff]   ;;  %3069 = vmatpush3.bf16.msra.mxu1 %v3256_v20 }
  0x1f   : > { %v3248_v13 = vld [vmem:[%s3520_s22 + $0x48] sm:$0xff]   ;;  %v3249_v14 = vld [vmem:[%s3520_s22 + $0x50] sm:$0xff]   ;;  %v3250_v15 = vld [vmem:[%s3520_s22 + $0x58] sm:$0xff]   ;;  %3070 = vmatprep.subr.bf16.mxu1 %v3257_v21  ;;  %1296 = vmatprep.subr.bf16.mxu0 %v3261_v24 }
  0x20   : > { %v3251_v16 = vld [vmem:[%s3520_s22 + $0x60] sm:$0xff]   ;;  %v3252_v17 = vld [vmem:[%s3520_s22 + $0x68] sm:$0xff]   ;;  %v3253_v18 = vld [vmem:[%s3520_s22 + $0x70] sm:$0xff]  }
  0x21   : > { %3035 = vmatmul.mubr.msk.bf16.vlgmr.msra.gmra.mxu0 %vm633_vm0, %v3240_v5  ;;  %v3254_v19 = vld [vmem:[%s3520_s22 + $0x78] sm:$0xff]   ;;  %v3270_v29 = vld [vmem:[%s4063_s5 + $0x44] ss:$8 sps:$4 sm:$0xff]   ;;  %v3268_v30 = vld [vmem:[%s4063_s5 + $0x40] ss:$8 sps:$4 sm:$0xff]   ;;  %s490_s22 = scalar_lea.vmem [#allocation3], %s2708_s16 }
  0x22   : > { %3038 = vmatprep.mubr.msk.bf16.mxu0 %vm633_vm0, %v3241_v6  ;;  %3071 = vmatpush3.bf16.msra.mxu1 %v3257_v21  ;;  %v3265_v28 = vld [vmem:[%s4063_s5 + $0x50] ss:$8 sps:$4 sm:$0xff]   ;;  %v3273_v31 = vld [vmem:[%s4063_s5 + $0x34] ss:$8 sps:$4 sm:$0xff]   ;;  %v3276_v33 = vld [vmem:[%s4063_s5 + $0x24] ss:$8 sps:$4 sm:$0xff]  }
  0x23   : > { %3072 = vmatprep.subr.bf16.mxu1 %v3258_v22  ;;  %1297 = vmatpush1.bf16.msra.mxu0 %v3259_v23  ;;  %v3271_v32 = vld [vmem:[%s4063_s5 + $0x30] ss:$8 sps:$4 sm:$0xff]   ;;  %v3274_v34 = vld [vmem:[%s4063_s5 + $0x20] ss:$8 sps:$4 sm:$0xff]   ;;  %v3279_v35 = vld [vmem:[%s4063_s5 + $0x14] ss:$8 sps:$4 sm:$0xff]  }
  0x24   : > { %1298 = vmatprep.subr.bf16.mxu0 %v3264_v25  ;;  %v3277_v36 = vld [vmem:[%s4063_s5 + $0x10] ss:$8 sps:$4 sm:$0xff]   ;;  %v3608_v39 = vld [vmem:[%s4084_s2] ss:$0 sm:$0xff]  ;;  %s2645_s14 = sshll.u32 %s490_s22, 4  ;;  %s3317_s16 = scalar_lea.vmem %s3316_s1, 64  ;;  %s2646_s14 = int_to_ptr.vmem [resolvable:$true] %s2645_s14 }
  0x25   : > { %s3311_s24 = scalar_lea.vmem %s2646_s14, 32  ;;  %p3318_p0 = scmp.lt.s32.totalorder %s2646_s14, %s3316_s1 }
  0x26   : > { %3073 = vmatpush3.bf16.msra.mxu1 %v3258_v22  ;;  %p3312_p11 = scmp.ne.s32.totalorder %s2646_s14, %s3311_s24  ;;  %p3319_p1 = scmp.lt.s32.totalorder %s3317_s16, %s3311_s24 }
  0x27   : > { %1299 = vmatpush1.bf16.msra.mxu0 %v3262_v26 }
  0x28   : > { %1300 = vmatprep.subr.bf16.mxu0 %v3267_v27  ;;  %p3313_p12 = pnand %p3312_p11, %p3494_p5  ;;  %p3320_p2 = por %p3319_p1, %p3318_p0 }
  0x29   : > { %3039 = vmatmul.mubr.msk.bf16.gmra.mxu0 %vm633_vm0, %v3242_v7 }
  0x2a   : > { %3042 = vmatprep.mubr.msk.bf16.mxu0 %vm633_vm0, %v3243_v8  ;;  %p3314_p13 = pneg %p3313_p12 }
  0x2b   : > { %1301 = vmatpush1.bf16.msra.mxu0 %v3265_v28 }
  0x2c   : > { %1302 = vmatprep.subr.bf16.mxu0 %v3270_v29  ;;  %p3321_p3 = pnand %p3320_p2, %p3314_p13 }
  0x2f   : > { %1303 = vmatpush1.bf16.msra.mxu0 %v3268_v30 }
  0x30   : > { %1304 = vmatprep.subr.bf16.mxu0 %v3273_v31 }
  0x31   : > { %3043 = vmatmul.mubr.msk.bf16.gmra.mxu0 %vm633_vm0, %v3244_v9 }
  0x32   : > { %3046 = vmatprep.mubr.msk.bf16.mxu0 %vm633_vm0, %v3245_v10 }
  0x33   : > { %1305 = vmatpush1.bf16.msra.mxu0 %v3271_v32 }
  0x34   : > { %1306 = vmatprep.subr.bf16.mxu0 %v3276_v33 }
  0x37   : > { %1307 = vmatpush1.bf16.msra.mxu0 %v3274_v34 }
  0x38   : > { %1308 = vmatprep.subr.bf16.mxu0 %v3279_v35 }
  0x39   : > { %3047 = vmatmul.mubr.msk.bf16.gmra.mxu0 %vm633_vm0, %v3246_v11 }
  0x3a   : > { %3050 = vmatprep.mubr.msk.bf16.mxu0 %vm633_vm0, %v3247_v12 }
  0x3b   : > { %1309 = vmatpush1.bf16.msra.mxu0 %v3277_v36 }
  0x41   : > { %3051 = vmatmul.mubr.msk.bf16.gmra.mxu0 %vm633_vm0, %v3248_v13 }
  0x42   : > { %3054 = vmatprep.mubr.msk.bf16.mxu0 %vm633_vm0, %v3249_v14 }
  0x49   : > { %3055 = vmatmul.mubr.msk.bf16.gmra.mxu0 %vm633_vm0, %v3250_v15 }
  0x4a   : > { %3058 = vmatprep.mubr.msk.bf16.mxu0 %vm633_vm0, %v3251_v16 }
  0x51   : > { %3059 = vmatmul.mubr.msk.bf16.gmra.mxu0 %vm633_vm0, %v3252_v17 }
  0x52   : > { %3062 = vmatprep.mubr.msk.bf16.mxu0 %vm633_vm0, %v3253_v18 }
  0x59   : > { %3063 = vmatmul.mubr.msk.bf16.gmra.mxu0 %vm633_vm0, %v3254_v19 }
  0xe1   : > { %v3036_v37 = vpop.f32.mrf.mxu0 }
  0xe2   : > { %v725_v43 = vadd.f32 %v3036_v37, %v3608_v39 }
  0xe3   : > { %v716_v38 = vpop.f32.mrf.mxu0 }
  0xe4   : > { %v717_v41 = vadd.f32 %v3608_v39, %v716_v38  ;;  %v845_v50 = vmax.f32 %v725_v43, 0.0 }
  0xe5   : > { %v3037_v40 = vpop.f32.mrf.mxu0 }
  0xe6   : > { %v728_v42 = vadd.f32 %v3037_v40, %v3608_v39  ;;  %v843_v48 = vmax.f32 %v717_v41, 0.0 }
  0xe7   : > { %v719_v44 = vpop.f32.mrf.mxu0 }
  0xe8   : > { %v720_v45 = vadd.f32 %v3608_v39, %v719_v44  ;;  %v846_v46 = vmax.f32 %v728_v42, 0.0 }
  0xe9   : > { %v3040_v47 = vpop.f32.mrf.mxu0 }
  0xea   : > { %v844_v49 = vmax.f32 %v720_v45, 0.0  ;;  %v741_v51 = vadd.f32 %v3040_v47, %v3608_v39  ;;  %v876_v55 = vpack.c.bf16 %v846_v46, %v845_v50 }
  0xeb   : > { %v732_v52 = vpop.f32.mrf.mxu0 }
  0xec   : > { %v733_v53 = vadd.f32 %v3608_v39, %v732_v52  ;;  %v875_v54 = vpack.c.bf16 %v844_v49, %v843_v48  ;;  %v849_v58 = vmax.f32 %v741_v51, 0.0 }
  0xed   : > { %v3041_v56 = vpop.f32.mrf.mxu0 }
  0xee   : > { %v744_v57 = vadd.f32 %v3041_v56, %v3608_v39  ;;  %3074 = vmatprep.mubr.msk.bf16.mxu1 %vm930_vm1, %v875_v54  ;;  %v847_v60 = vmax.f32 %v733_v53, 0.0 }
  0xef   : > { %v735_v59 = vpop.f32.mrf.mxu0  ;;  %3075 = vmatmul.mubr.msk.bf16.vlgmr.msra.gmra.mxu1 %vm930_vm1, %v876_v55 }
  0xf0   : > { %v850_v61 = vmax.f32 %v744_v57, 0.0  ;;  %v736_v62 = vadd.f32 %v3608_v39, %v735_v59 }
  0xf1   : > { %v3044_v63 = vpop.f32.mrf.mxu0 }
  0xf2   : > { %v848_v0 = vmax.f32 %v736_v62, 0.0  ;;  %v878_v1 = vpack.c.bf16 %v850_v61, %v849_v58  ;;  %v757_v2 = vadd.f32 %v3044_v63, %v3608_v39 }
  0xf3   : > { %v748_v3 = vpop.f32.mrf.mxu0 }
  0xf4   : > { %v877_v4 = vpack.c.bf16 %v848_v0, %v847_v60  ;;  %v749_v5 = vadd.f32 %v3608_v39, %v748_v3  ;;  %v853_v8 = vmax.f32 %v757_v2, 0.0 }
  0xf5   : > { %v3045_v6 = vpop.f32.mrf.mxu0 }
  0xf6   : > { %3078 = vmatprep.mubr.msk.bf16.mxu1 %vm930_vm1, %v877_v4  ;;  %v760_v7 = vadd.f32 %v3045_v6, %v3608_v39  ;;  %v851_v10 = vmax.f32 %v749_v5, 0.0 }
  0xf7   : > { %3079 = vmatmul.mubr.msk.bf16.gmra.mxu1 %vm930_vm1, %v878_v1  ;;  %v751_v9 = vpop.f32.mrf.mxu0 }
  0xf8   : > { %v854_v11 = vmax.f32 %v760_v7, 0.0  ;;  %v752_v12 = vadd.f32 %v3608_v39, %v751_v9 }
  0xf9   : > { %v3048_v13 = vpop.f32.mrf.mxu0 }
  0xfa   : > { %v852_v14 = vmax.f32 %v752_v12, 0.0  ;;  %v880_v15 = vpack.c.bf16 %v854_v11, %v853_v8  ;;  %v773_v16 = vadd.f32 %v3048_v13, %v3608_v39 }
  0xfb   : > { %v764_v17 = vpop.f32.mrf.mxu0 }
  0xfc   : > { %v879_v18 = vpack.c.bf16 %v852_v14, %v851_v10  ;;  %v765_v19 = vadd.f32 %v3608_v39, %v764_v17  ;;  %v857_v22 = vmax.f32 %v773_v16, 0.0 }
  0xfd   : > { %v3049_v20 = vpop.f32.mrf.mxu0 }
  0xfe   : > { %3082 = vmatprep.mubr.msk.bf16.mxu1 %vm930_vm1, %v879_v18  ;;  %v776_v21 = vadd.f32 %v3049_v20, %v3608_v39  ;;  %v855_v24 = vmax.f32 %v765_v19, 0.0 }
  0xff   : > { %3083 = vmatmul.mubr.msk.bf16.gmra.mxu1 %vm930_vm1, %v880_v15  ;;  %v767_v23 = vpop.f32.mrf.mxu0 }
 0x100   : > { %v858_v25 = vmax.f32 %v776_v21, 0.0  ;;  %v768_v26 = vadd.f32 %v3608_v39, %v767_v23  ;;  %v3282_v23 = vld [vmem:[%s4063_s5 + $0x4] ss:$8 sps:$4 sm:$0xff]  }
 0x101   : > { %v3052_v27 = vpop.f32.mrf.mxu0  ;;  %1310 = vmatprep.subr.bf16.mxu0 %v3282_v23 }
 0x102   : > { %v856_v28 = vmax.f32 %v768_v26, 0.0  ;;  %v882_v29 = vpack.c.bf16 %v858_v25, %v857_v22  ;;  %v789_v30 = vadd.f32 %v3052_v27, %v3608_v39  ;;  %v3373_v25 = vmov 0   ;;  %v3670_v27 = vld [vmem:[%s4062_s4] ss:$0 sm:$0xff] }
 0x103   : > { %v780_v31 = vpop.f32.mrf.mxu0  ;;  %1328 = vmatprep.mubr.bf16.mxu0 %v3373_v25  ;;  %3236 = vset.pattern.permute.xlu1 %v3373_v25 }
 0x104   : > { %v881_v32 = vpack.c.bf16 %v856_v28, %v855_v24  ;;  %v781_v33 = vadd.f32 %v3608_v39, %v780_v31  ;;  %v861_v36 = vmax.f32 %v789_v30, 0.0  ;;  %v3280_v24 = vld [vmem:[%s4063_s5] ss:$8 sps:$4 sm:$0xff]   ;;  %3235 = vset.pattern.permute.xlu0 %v3373_v25  ;;  %v3283_v30 = vld [vmem:[%s4065_s7 + $0x78] sm:$0xff]  }
 0x105   : > { %v3053_v34 = vpop.f32.mrf.mxu0  ;;  %1311 = vmatpush1.bf16.msra.mxu0 %v3280_v24  ;;  %v3284_v31 = vld [vmem:[%s4065_s7 + $0x38] sm:$0xff]   ;;  %2874 = vmatprep.subr.bf16.mxu1 %v3283_v30 }
 0x106   : > { %3086 = vmatprep.mubr.msk.bf16.mxu1 %vm930_vm1, %v881_v32  ;;  %v792_v35 = vadd.f32 %v3053_v34, %v3608_v39  ;;  %v859_v38 = vmax.f32 %v781_v33, 0.0  ;;  %v3285_v32 = vld [vmem:[%s4065_s7 + $0x70] sm:$0xff]   ;;  %2875 = vmatpush3.bf16.msra.mxu1 %v3284_v31 }
 0x107   : > { %3087 = vmatmul.mubr.msk.bf16.gmra.mxu1 %vm930_vm1, %v882_v29  ;;  %v783_v37 = vpop.f32.mrf.mxu0  ;;  %2876 = vmatprep.subr.bf16.mxu1 %v3285_v32 }
 0x108   : > { %v862_v40 = vmax.f32 %v792_v35, 0.0  ;;  %v784_v41 = vadd.f32 %v3608_v39, %v783_v37 }
 0x109   : > { %v3056_v42 = vpop.f32.mrf.mxu0 }
 0x10a   : > { %v860_v43 = vmax.f32 %v784_v41, 0.0  ;;  %v884_v44 = vpack.c.bf16 %v862_v40, %v861_v36  ;;  %v805_v45 = vadd.f32 %v3056_v42, %v3608_v39  ;;  %v3286_v36 = vld [vmem:[%s4065_s7 + $0x30] sm:$0xff]   ;;  %v3287_v40 = vld [vmem:[%s4065_s7 + $0x68] sm:$0xff]  }
 0x10b   : > { %v796_v46 = vpop.f32.mrf.mxu0  ;;  %2877 = vmatpush3.bf16.msra.mxu1 %v3286_v36 }
 0x10c   : > { %v883_v47 = vpack.c.bf16 %v860_v43, %v859_v38  ;;  %v797_v48 = vadd.f32 %v3608_v39, %v796_v46  ;;  %v865_v51 = vmax.f32 %v805_v45, 0.0  ;;  %v3288_v45 = vld [vmem:[%s4065_s7 + $0x28] sm:$0xff]   ;;  %2878 = vmatprep.subr.bf16.mxu1 %v3287_v40 }
 0x10d   : > { %v3057_v49 = vpop.f32.mrf.mxu0 }
 0x10e   : > { %3090 = vmatprep.mubr.msk.bf16.mxu1 %vm930_vm1, %v883_v47  ;;  %v808_v50 = vadd.f32 %v3057_v49, %v3608_v39  ;;  %v863_v53 = vmax.f32 %v797_v48, 0.0  ;;  %v3289_v47 = vld [vmem:[%s4065_s7 + $0x60] sm:$0xff]  }
 0x10f   : > { %3091 = vmatmul.mubr.msk.bf16.gmra.mxu1 %vm930_vm1, %v884_v44  ;;  %v799_v52 = vpop.f32.mrf.mxu0 }
 0x110   : > { %v866_v54 = vmax.f32 %v808_v50, 0.0  ;;  %v800_v55 = vadd.f32 %v3608_v39, %v799_v52  ;;  %2879 = vmatpush3.bf16.msra.mxu1 %v3288_v45  ;;  %v3290_v50 = vld [vmem:[%s4065_s7 + $0x20] sm:$0xff]   ;;  %v3291_v52 = vld [vmem:[%s4065_s7 + $0x58] sm:$0xff]  }
 0x111   : > { %v3060_v56 = vpop.f32.mrf.mxu0  ;;  %2880 = vmatprep.subr.bf16.mxu1 %v3289_v47 }
 0x112   : > { %v864_v57 = vmax.f32 %v800_v55, 0.0  ;;  %v886_v58 = vpack.c.bf16 %v866_v54, %v865_v51  ;;  %v821_v59 = vadd.f32 %v3060_v56, %v3608_v39  ;;  %v3292_v56 = vld [vmem:[%s4065_s7 + $0x18] sm:$0xff]  }
 0x113   : > { %v812_v60 = vpop.f32.mrf.mxu0 }
 0x114   : > { %v885_v61 = vpack.c.bf16 %v864_v57, %v863_v53  ;;  %v813_v62 = vadd.f32 %v3608_v39, %v812_v60  ;;  %v869_v1 = vmax.f32 %v821_v59, 0.0  ;;  %2881 = vmatpush3.bf16.msra.mxu1 %v3290_v50 }
 0x115   : > { %v3061_v63 = vpop.f32.mrf.mxu0  ;;  %2882 = vmatprep.subr.bf16.mxu1 %v3291_v52 }
 0x116   : > { %3094 = vmatprep.mubr.msk.bf16.mxu1 %vm930_vm1, %v885_v61  ;;  %v824_v0 = vadd.f32 %v3061_v63, %v3608_v39  ;;  %v867_v3 = vmax.f32 %v813_v62, 0.0  ;;  %v3294_v61 = vld [vmem:[%s4065_s7 + $0x10] sm:$0xff]   ;;  %v3295_v63 = vld [vmem:[%s4065_s7 + $0x48] sm:$0xff]  }
 0x117   : > { %3095 = vmatmul.mubr.msk.bf16.gmra.mxu1 %vm930_vm1, %v886_v58  ;;  %v815_v2 = vpop.f32.mrf.mxu0  ;;  %v3293_v58 = vld [vmem:[%s4065_s7 + $0x50] sm:$0xff]  }
 0x118   : > { %v870_v4 = vmax.f32 %v824_v0, 0.0  ;;  %v816_v5 = vadd.f32 %v3608_v39, %v815_v2  ;;  %2883 = vmatpush3.bf16.msra.mxu1 %v3292_v56  ;;  %v3297_v56 = vld [vmem:[%s4065_s7 + $0x40] sm:$0xff]  }
 0x119   : > { %v3064_v6 = vpop.f32.mrf.mxu0  ;;  %2884 = vmatprep.subr.bf16.mxu1 %v3293_v58 }
 0x11a   : > { %v868_v7 = vmax.f32 %v816_v5, 0.0  ;;  %v888_v8 = vpack.c.bf16 %v870_v4, %v869_v1  ;;  %v837_v9 = vadd.f32 %v3064_v6, %v3608_v39 }
 0x11b   : > { %v828_v10 = vpop.f32.mrf.mxu0 }
 0x11c   : > { %v887_v11 = vpack.c.bf16 %v868_v7, %v867_v3  ;;  %v829_v12 = vadd.f32 %v3608_v39, %v828_v10  ;;  %v873_v15 = vmax.f32 %v837_v9, 0.0  ;;  %2885 = vmatpush3.bf16.msra.mxu1 %v3294_v61  ;;  %v3296_v3 = vld [vmem:[%s4065_s7 + $0x8] sm:$0xff]  }
 0x11d   : > { %v3065_v13 = vpop.f32.mrf.mxu0  ;;  %2886 = vmatprep.subr.bf16.mxu1 %v3295_v63 }
 0x11e   : > { %3098 = vmatprep.mubr.msk.bf16.mxu1 %vm930_vm1, %v887_v11  ;;  %v840_v14 = vadd.f32 %v3065_v13, %v3608_v39  ;;  %v871_v17 = vmax.f32 %v829_v12, 0.0 }
 0x11f   : > { %3099 = vmatmul.mubr.msk.bf16.gmra.mxu1 %vm930_vm1, %v888_v8  ;;  %v831_v16 = vpop.f32.mrf.mxu0 }
 0x120   : > { %v874_v18 = vmax.f32 %v840_v14, 0.0  ;;  %v832_v19 = vadd.f32 %v3608_v39, %v831_v16  ;;  %2887 = vmatpush3.bf16.msra.mxu1 %v3296_v3 }
 0x121   : > { %2888 = vmatprep.subr.bf16.mxu1 %v3297_v56 }
 0x122   : > { %v872_v20 = vmax.f32 %v832_v19, 0.0  ;;  %v890_v21 = vpack.c.bf16 %v874_v18, %v873_v15 }
 0x124   : > { %v889_v22 = vpack.c.bf16 %v872_v20, %v871_v17 }
 0x126   : > { %3102 = vmatprep.mubr.msk.bf16.mxu1 %vm930_vm1, %v889_v22 }
 0x127   : > { %3103 = vmatmul.mubr.msk.bf16.gmra.mxu1 %vm930_vm1, %v890_v21 }
 0x1af   : > { %v3076_v39 = vpop.f32.mrf.mxu1 }
 0x1b0   : > { %v1022_v46 = vadd.f32 %v3076_v39, %v3670_v27 }
 0x1b1   : > { %v1013_v26 = vpop.f32.mrf.mxu1 }
 0x1b2   : > { %v1014_v29 = vadd.f32 %v3670_v27, %v1013_v26  ;;  %v1142_v51 = vmax.f32 %v1022_v46, 0.0 }
 0x1b3   : > { %v3077_v28 = vpop.f32.mrf.mxu1 }
 0x1b4   : > { %v1140_v37 = vmax.f32 %v1014_v29, 0.0  ;;  %v1025_v42 = vadd.f32 %v3077_v28, %v3670_v27 }
 0x1b5   : > { %v1016_v33 = vpop.f32.mrf.mxu1 }
 0x1b6   : > { %v1017_v34 = vadd.f32 %v3670_v27, %v1016_v33  ;;  %v1143_v48 = vmax.f32 %v1025_v42, 0.0 }
 0x1b7   : > { %v3080_v35 = vpop.f32.mrf.mxu1 }
 0x1b8   : > { %v1141_v38 = vmax.f32 %v1017_v34, 0.0  ;;  %v1173_v53 = vpack.c.bf16 %v1143_v48, %v1142_v51  ;;  %v1038_v4 = vadd.f32 %v3080_v35, %v3670_v27 }
 0x1b9   : > { %v1029_v41 = vpop.f32.mrf.mxu1 }
 0x1ba   : > { %v1172_v43 = vpack.c.bf16 %v1141_v38, %v1140_v37  ;;  %v1030_v57 = vadd.f32 %v3670_v27, %v1029_v41  ;;  %v1146_v7 = vmax.f32 %v1038_v4, 0.0 }
 0x1bb   : > { %v3081_v44 = vpop.f32.mrf.mxu1 }
 0x1bc   : > { %1329 = vmatmul.mubr.bf16.vlgmr.msra.gmra.mxu0 %v1172_v43  ;;  %v1144_v62 = vmax.f32 %v1030_v57, 0.0  ;;  %v1041_v0 = vadd.f32 %v3081_v44, %v3670_v27  ;;  %v3298_v57 = vld [vmem:[%s4065_s7] sm:$0xff]  }
 0x1bd   : > { %1338 = vmatprep.mubr.bf16.mxu0 %v3373_v25  ;;  %v1032_v49 = vpop.f32.mrf.mxu1  ;;  %2889 = vmatpush3.bf16.msra.mxu1 %v3298_v57 }
 0x1be   : > { %v1033_v54 = vadd.f32 %v3670_v27, %v1032_v49  ;;  %v1147_v5 = vmax.f32 %v1041_v0, 0.0 }
 0x1bf   : > { %v3084_v55 = vpop.f32.mrf.mxu1 }
 0x1c0   : > { %v1145_v59 = vmax.f32 %v1033_v54, 0.0  ;;  %v1175_v8 = vpack.c.bf16 %v1147_v5, %v1146_v7  ;;  %v1054_v15 = vadd.f32 %v3084_v55, %v3670_v27 }
 0x1c1   : > { %v1045_v60 = vpop.f32.mrf.mxu1 }
 0x1c2   : > { %v1174_v1 = vpack.c.bf16 %v1145_v59, %v1144_v62  ;;  %v1046_v9 = vadd.f32 %v3670_v27, %v1045_v60  ;;  %v1150_v19 = vmax.f32 %v1054_v15, 0.0 }
 0x1c3   : > { %v3085_v2 = vpop.f32.mrf.mxu1 }
 0x1c4   : > { %1339 = vmatmul.mubr.bf16.gmra.mxu0 %v1173_v53  ;;  %v1148_v12 = vmax.f32 %v1046_v9, 0.0  ;;  %v1057_v16 = vadd.f32 %v3085_v2, %v3670_v27 }
 0x1c5   : > { %1348 = vmatprep.mubr.bf16.mxu0 %v3373_v25  ;;  %v1048_v6 = vpop.f32.mrf.mxu1 }
 0x1c6   : > { %v1049_v10 = vadd.f32 %v3670_v27, %v1048_v6  ;;  %v1151_v20 = vmax.f32 %v1057_v16, 0.0 }
 0x1c7   : > { %v3088_v11 = vpop.f32.mrf.mxu1 }
 0x1c8   : > { %v1149_v13 = vmax.f32 %v1049_v10, 0.0  ;;  %v1177_v22 = vpack.c.bf16 %v1151_v20, %v1150_v19  ;;  %v1070_v30 = vadd.f32 %v3088_v11, %v3670_v27 }
 0x1c9   : > { %v1061_v14 = vpop.f32.mrf.mxu1 }
 0x1ca   : > { %v1176_v17 = vpack.c.bf16 %v1149_v13, %v1148_v12  ;;  %v1062_v23 = vadd.f32 %v3670_v27, %v1061_v14  ;;  %v1154_v34 = vmax.f32 %v1070_v30, 0.0  ;;  %v1206_v30 = vlaneseq }
 0x1cb   : > { %v3089_v18 = vpop.f32.mrf.mxu1 }
 0x1cc   : > { %1349 = vmatmul.mubr.bf16.gmra.mxu0 %v1174_v1  ;;  %v1152_v26 = vmax.f32 %v1062_v23, 0.0  ;;  %v1073_v31 = vadd.f32 %v3089_v18, %v3670_v27  ;;  %vm2627_vm2 = vcmp.lt.s32.totalorder %v1206_v30, 256 }
 0x1cd   : > { %1358 = vmatprep.mubr.bf16.mxu0 %v3373_v25  ;;  %v1064_v21 = vpop.f32.mrf.mxu1 }
 0x1ce   : > { %v1065_v24 = vadd.f32 %v3670_v27, %v1064_v21  ;;  %v1155_v35 = vmax.f32 %v1073_v31, 0.0  ;;  %v3768_v31 = vshrl.u32 %v1206_v30, 7 }
 0x1cf   : > { %v3092_v39 = vpop.f32.mrf.mxu1 }
 0x1d0   : > { %v1153_v28 = vmax.f32 %v1065_v24, 0.0  ;;  %v1179_v37 = vpack.c.bf16 %v1155_v35, %v1154_v34  ;;  %v1086_v45 = vadd.f32 %v3092_v39, %v3670_v27 }
 0x1d1   : > { %v1077_v29 = vpop.f32.mrf.mxu1 }
 0x1d2   : > { %v1178_v32 = vpack.c.bf16 %v1153_v28, %v1152_v26  ;;  %v1078_v38 = vadd.f32 %v3670_v27, %v1077_v29  ;;  %v1158_v49 = vmax.f32 %v1086_v45, 0.0 }
 0x1d3   : > { %v3093_v33 = vpop.f32.mrf.mxu1 }
 0x1d4   : > { %1359 = vmatmul.mubr.bf16.gmra.mxu0 %v1175_v8  ;;  %v1156_v42 = vmax.f32 %v1078_v38, 0.0  ;;  %v1089_v46 = vadd.f32 %v3093_v33, %v3670_v27  ;;  %v1208_v33 = vsub.s32 0, %v3768_v31 }
 0x1d5   : > { %1368 = vmatprep.mubr.bf16.mxu0 %v3373_v25  ;;  %v1080_v36 = vpop.f32.mrf.mxu1 }
 0x1d6   : > { %v1081_v40 = vadd.f32 %v3670_v27, %v1080_v36  ;;  %v1159_v50 = vmax.f32 %v1089_v46, 0.0 }
 0x1d7   : > { %v3096_v41 = vpop.f32.mrf.mxu1 }
 0x1d8   : > { %v1157_v43 = vmax.f32 %v1081_v40, 0.0  ;;  %v1181_v52 = vpack.c.bf16 %v1159_v50, %v1158_v49  ;;  %v1102_v61 = vadd.f32 %v3096_v41, %v3670_v27 }
 0x1d9   : > { %v1093_v44 = vpop.f32.mrf.mxu1 }
 0x1da   : > { %v1180_v47 = vpack.c.bf16 %v1157_v43, %v1156_v42  ;;  %v1094_v53 = vadd.f32 %v3670_v27, %v1093_v44  ;;  %v1162_v1 = vmax.f32 %v1102_v61, 0.0  ;;  %v3299_v43 = vld [vmem:[%s4067_s9 + $0x38] sm:$0xff]   ;;  %v3300_v44 = vld [vmem:[%s4067_s9 + $0x30] sm:$0xff]  }
 0x1db   : > { %v3097_v48 = vpop.f32.mrf.mxu1  ;;  %3106 = vmatprep.subr.bf16.mxu0 %v3299_v43 }
 0x1dc   : > { %1369 = vmatmul.mubr.bf16.gmra.mxu0 %v1176_v17  ;;  %v1160_v58 = vmax.f32 %v1094_v53, 0.0  ;;  %v1105_v62 = vadd.f32 %v3097_v48, %v3670_v27 }
 0x1dd   : > { %1378 = vmatprep.mubr.bf16.mxu0 %v3373_v25  ;;  %v1096_v51 = vpop.f32.mrf.mxu1  ;;  %3107 = vmatpush3.bf16.msra.mxu0 %v3299_v43 }
 0x1de   : > { %v1097_v54 = vadd.f32 %v3670_v27, %v1096_v51  ;;  %v1163_v2 = vmax.f32 %v1105_v62, 0.0  ;;  %3108 = vmatprep.subr.bf16.mxu0 %v3300_v44 }
 0x1df   : > { %v3100_v55 = vpop.f32.mrf.mxu1 }
 0x1e0   : > { %v1161_v59 = vmax.f32 %v1097_v54, 0.0  ;;  %v1183_v4 = vpack.c.bf16 %v1163_v2, %v1162_v1  ;;  %v1118_v11 = vadd.f32 %v3100_v55, %v3670_v27 }
 0x1e1   : > { %v1109_v60 = vpop.f32.mrf.mxu1  ;;  %3109 = vmatpush3.bf16.msra.mxu0 %v3300_v44 }
 0x1e2   : > { %v1182_v63 = vpack.c.bf16 %v1161_v59, %v1160_v58  ;;  %v1110_v5 = vadd.f32 %v3670_v27, %v1109_v60  ;;  %v1166_v15 = vmax.f32 %v1118_v11, 0.0  ;;  %v3302_v60 = vld [vmem:[%s4067_s9 + $0x20] sm:$0xff]  }
 0x1e3   : > { %v3101_v0 = vpop.f32.mrf.mxu1 }
 0x1e4   : > { %1379 = vmatmul.mubr.bf16.gmra.mxu0 %v1177_v22  ;;  %v1164_v8 = vmax.f32 %v1110_v5, 0.0  ;;  %v1121_v12 = vadd.f32 %v3101_v0, %v3670_v27 }
 0x1e5   : > { %1388 = vmatprep.mubr.bf16.mxu0 %v3373_v25  ;;  %v1112_v3 = vpop.f32.mrf.mxu1 }
 0x1e6   : > { %v1113_v6 = vadd.f32 %v3670_v27, %v1112_v3  ;;  %v1167_v16 = vmax.f32 %v1121_v12, 0.0 }
 0x1e7   : > { %v3104_v7 = vpop.f32.mrf.mxu1 }
 0x1e8   : > { %v1165_v9 = vmax.f32 %v1113_v6, 0.0  ;;  %v1185_v18 = vpack.c.bf16 %v1167_v16, %v1166_v15  ;;  %v1134_v23 = vadd.f32 %v3104_v7, %v3670_v27 }
 0x1e9   : > { %v1125_v10 = vpop.f32.mrf.mxu1 }
 0x1ea   : > { %v1184_v13 = vpack.c.bf16 %v1165_v9, %v1164_v8  ;;  %v1126_v19 = vadd.f32 %v3670_v27, %v1125_v10  ;;  %v1170_v26 = vmax.f32 %v1134_v23, 0.0 }
 0x1eb   : > { %v3105_v14 = vpop.f32.mrf.mxu1 }
 0x1ec   : > { %1389 = vmatmul.mubr.bf16.gmra.mxu0 %v1178_v32  ;;  %v1168_v21 = vmax.f32 %v1126_v19, 0.0  ;;  %v1137_v24 = vadd.f32 %v3105_v14, %v3670_v27  ;;  %v1212_v32 = vsub.s32 1, %v3768_v31 }
 0x1ed   : > { %1398 = vmatprep.mubr.bf16.mxu0 %v3373_v25  ;;  %v1128_v17 = vpop.f32.mrf.mxu1 }
 0x1ee   : > { %v1129_v20 = vadd.f32 %v3670_v27, %v1128_v17  ;;  %v1171_v28 = vmax.f32 %v1137_v24, 0.0  ;;  %v1204_v27 = vld [vmem:[%s4064_s6] sm:$0x3] }
 0x1ef   : > { %v3775_v35 = vrot.slane %v1204_v27, %v1212_v32 }
 0x1f0   : > { %v1169_v22 = vmax.f32 %v1129_v20, 0.0  ;;  %v1187_v29 = vpack.c.bf16 %v1171_v28, %v1170_v26 }
 0x1f2   : > { %v1186_v39 = vpack.c.bf16 %v1169_v22, %v1168_v21 }
 0x1f4   : > { %1399 = vmatmul.mubr.bf16.gmra.mxu0 %v1179_v37 }
 0x1f5   : > { %1408 = vmatprep.mubr.bf16.mxu0 %v3373_v25 }
 0x1fc   : > { %1409 = vmatmul.mubr.bf16.gmra.mxu0 %v1180_v47 }
 0x1fd   : > { %1418 = vmatprep.mubr.bf16.mxu0 %v3373_v25 }
 0x204   : > { %1419 = vmatmul.mubr.bf16.gmra.mxu0 %v1181_v52  ;;  %v3301_v52 = vld [vmem:[%s4067_s9 + $0x28] sm:$0xff]  }
 0x205   : > { %1428 = vmatprep.mubr.bf16.mxu0 %v3373_v25  ;;  %3110 = vmatprep.subr.bf16.mxu0 %v3301_v52 }
 0x206   : > { %3111 = vmatpush3.bf16.msra.mxu0 %v3301_v52 }
 0x207   : > { %3112 = vmatprep.subr.bf16.mxu0 %v3302_v60 }
 0x20a   : > { %3113 = vmatpush3.bf16.msra.mxu0 %v3302_v60 }
 0x20c   : > { %1429 = vmatmul.mubr.bf16.gmra.mxu0 %v1182_v63 }
 0x20d   : > { %1438 = vmatprep.mubr.bf16.mxu0 %v3373_v25 }
 0x214   : > { %1439 = vmatmul.mubr.bf16.gmra.mxu0 %v1183_v4 }
 0x215   : > { %1448 = vmatprep.mubr.bf16.mxu0 %v3373_v25 }
 0x21c   : > { %1449 = vmatmul.mubr.bf16.gmra.mxu0 %v1184_v13 }
 0x21d   : > { %1458 = vmatprep.mubr.bf16.mxu0 %v3373_v25 }
 0x224   : > { %1459 = vmatmul.mubr.bf16.gmra.mxu0 %v1185_v18 }
 0x225   : > { %1468 = vmatprep.mubr.bf16.mxu0 %v3373_v25 }
 0x22c   : > { %1469 = vmatmul.mubr.bf16.gmra.mxu0 %v1186_v39 }
 0x22d   : > { %1478 = vmatprep.mubr.bf16.mxu0 %v3373_v25  ;;  %v3779_v25 = vrot.slane %v1204_v27, %v1208_v33 }
 0x234   : > { %1479 = vmatmul.mubr.bf16.gmra.mxu0 %v1187_v29 }
 0x27c   : > { %v1330_v34 = vpop.f32.mrf.mxu0 }
 0x27d   : > { %v1331_v41 = vadd.f32 %v1330_v34, %v3779_v25 }
 0x27e   : > { %v1332_v36 = vpop.f32.mrf.mxu0 }
 0x27f   : > { %v1333_v38 = vadd.f32 %v1332_v36, %v3775_v35  ;;  %v1489_v50 = vmax.f32 %v1331_v41, 0.0 }
 0x280   : > { %v1334_v37 = vpop.f32.mrf.mxu0 }
 0x281   : > { %v1335_v40 = vadd.f32 %v1334_v37, %v3779_v25  ;;  %v1490_v48 = vmax.f32 %v1333_v38, 0.0 }
 0x282   : > { %v1336_v42 = vpop.f32.mrf.mxu0 }
 0x283   : > { %v1337_v45 = vadd.f32 %v1336_v42, %v3775_v35  ;;  %v1491_v46 = vmax.f32 %v1335_v40, 0.0 }
 0x284   : > { %v1340_v47 = vpop.f32.mrf.mxu0 }
 0x285   : > { %v1492_v49 = vmax.f32 %v1337_v45, 0.0  ;;  %v1553_v54 = vpack.c.bf16 %v1491_v46, %v1489_v50  ;;  %v1341_v58 = vadd.f32 %v1340_v47, %v3779_v25 }
 0x286   : > { %v1342_v51 = vpop.f32.mrf.mxu0 }
 0x287   : > { %v1554_v53 = vpack.c.bf16 %v1492_v49, %v1490_v48  ;;  %v1343_v56 = vadd.f32 %v1342_v51, %v3775_v35  ;;  %v1493_v2 = vmax.f32 %v1341_v58, 0.0 }
 0x288   : > { %v1344_v55 = vpop.f32.mrf.mxu0 }
 0x289   : > { %v1345_v57 = vadd.f32 %v1344_v55, %v3779_v25  ;;  %1752 = vmatprep.mubr.bf16.mxu1 %v1554_v53  ;;  %v1494_v0 = vmax.f32 %v1343_v56, 0.0 }
 0x28a   : > { %v1346_v59 = vpop.f32.mrf.mxu0  ;;  %1753 = vmatmul.mubr.bf16.vlgmr.msra.gmra.mxu1 %v1553_v54 }
 0x28b   : > { %v1347_v61 = vadd.f32 %v1346_v59, %v3775_v35  ;;  %v1495_v62 = vmax.f32 %v1345_v57, 0.0 }
 0x28c   : > { %v1350_v63 = vpop.f32.mrf.mxu0 }
 0x28d   : > { %v1496_v1 = vmax.f32 %v1347_v61, 0.0  ;;  %v1555_v5 = vpack.c.bf16 %v1495_v62, %v1493_v2  ;;  %v1351_v9 = vadd.f32 %v1350_v63, %v3779_v25 }
 0x28e   : > { %v1352_v3 = vpop.f32.mrf.mxu0 }
 0x28f   : > { %v1556_v4 = vpack.c.bf16 %v1496_v1, %v1494_v0  ;;  %v1353_v7 = vadd.f32 %v1352_v3, %v3775_v35  ;;  %v1497_v16 = vmax.f32 %v1351_v9, 0.0 }
 0x290   : > { %v1354_v6 = vpop.f32.mrf.mxu0 }
 0x291   : > { %v1355_v8 = vadd.f32 %v1354_v6, %v3779_v25  ;;  %1760 = vmatprep.mubr.bf16.mxu1 %v1556_v4  ;;  %v1498_v14 = vmax.f32 %v1353_v7, 0.0 }
 0x292   : > { %v1356_v10 = vpop.f32.mrf.mxu0  ;;  %1761 = vmatmul.mubr.bf16.gmra.mxu1 %v1555_v5 }
 0x293   : > { %v1357_v11 = vadd.f32 %v1356_v10, %v3775_v35  ;;  %v1499_v12 = vmax.f32 %v1355_v8, 0.0 }
 0x294   : > { %v1360_v13 = vpop.f32.mrf.mxu0 }
 0x295   : > { %v1500_v15 = vmax.f32 %v1357_v11, 0.0  ;;  %v1557_v19 = vpack.c.bf16 %v1499_v12, %v1497_v16  ;;  %v1361_v23 = vadd.f32 %v1360_v13, %v3779_v25 }
 0x296   : > { %v1362_v17 = vpop.f32.mrf.mxu0 }
 0x297   : > { %v1558_v18 = vpack.c.bf16 %v1500_v15, %v1498_v14  ;;  %v1363_v21 = vadd.f32 %v1362_v17, %v3775_v35  ;;  %v1501_v27 = vmax.f32 %v1361_v23, 0.0 }
 0x298   : > { %v1364_v20 = vpop.f32.mrf.mxu0 }
 0x299   : > { %v1365_v22 = vadd.f32 %v1364_v20, %v3779_v25  ;;  %1768 = vmatprep.mubr.bf16.mxu1 %v1558_v18  ;;  %v1502_v29 = vmax.f32 %v1363_v21, 0.0 }
 0x29a   : > { %v1366_v24 = vpop.f32.mrf.mxu0  ;;  %1769 = vmatmul.mubr.bf16.gmra.mxu1 %v1557_v19 }
 0x29b   : > { %v1367_v39 = vadd.f32 %v1366_v24, %v3775_v35  ;;  %v1503_v26 = vmax.f32 %v1365_v22, 0.0 }
 0x29c   : > { %v1370_v28 = vpop.f32.mrf.mxu0 }
 0x29d   : > { %v1504_v32 = vmax.f32 %v1367_v39, 0.0  ;;  %v1559_v37 = vpack.c.bf16 %v1503_v26, %v1501_v27  ;;  %v1371_v42 = vadd.f32 %v1370_v28, %v3779_v25 }
 0x29e   : > { %v1372_v34 = vpop.f32.mrf.mxu0 }
 0x29f   : > { %v1560_v36 = vpack.c.bf16 %v1504_v32, %v1502_v29  ;;  %v1373_v40 = vadd.f32 %v1372_v34, %v3775_v35  ;;  %v1505_v49 = vmax.f32 %v1371_v42, 0.0 }
 0x2a0   : > { %v1374_v38 = vpop.f32.mrf.mxu0 }
 0x2a1   : > { %v1375_v41 = vadd.f32 %v1374_v38, %v3779_v25  ;;  %1776 = vmatprep.mubr.bf16.mxu1 %v1560_v36  ;;  %v1506_v47 = vmax.f32 %v1373_v40, 0.0 }
 0x2a2   : > { %v1376_v43 = vpop.f32.mrf.mxu0  ;;  %1777 = vmatmul.mubr.bf16.gmra.mxu1 %v1559_v37 }
 0x2a3   : > { %v1377_v44 = vadd.f32 %v1376_v43, %v3775_v35  ;;  %v1507_v45 = vmax.f32 %v1375_v41, 0.0 }
 0x2a4   : > { %v1380_v46 = vpop.f32.mrf.mxu0 }
 0x2a5   : > { %v1508_v48 = vmax.f32 %v1377_v44, 0.0  ;;  %v1561_v52 = vpack.c.bf16 %v1507_v45, %v1505_v49  ;;  %v1381_v56 = vadd.f32 %v1380_v46, %v3779_v25 }
 0x2a6   : > { %v1382_v50 = vpop.f32.mrf.mxu0 }
 0x2a7   : > { %v1562_v51 = vpack.c.bf16 %v1508_v48, %v1506_v47  ;;  %v1383_v54 = vadd.f32 %v1382_v50, %v3775_v35  ;;  %v1509_v63 = vmax.f32 %v1381_v56, 0.0 }
 0x2a8   : > { %v1384_v53 = vpop.f32.mrf.mxu0 }
 0x2a9   : > { %v1385_v55 = vadd.f32 %v1384_v53, %v3779_v25  ;;  %1784 = vmatprep.mubr.bf16.mxu1 %v1562_v51  ;;  %v1510_v61 = vmax.f32 %v1383_v54, 0.0 }
 0x2aa   : > { %v1386_v57 = vpop.f32.mrf.mxu0  ;;  %1785 = vmatmul.mubr.bf16.gmra.mxu1 %v1561_v52 }
 0x2ab   : > { %v1387_v58 = vadd.f32 %v1386_v57, %v3775_v35  ;;  %v1511_v59 = vmax.f32 %v1385_v55, 0.0 }
 0x2ac   : > { %v1390_v60 = vpop.f32.mrf.mxu0 }
 0x2ad   : > { %v1512_v62 = vmax.f32 %v1387_v58, 0.0  ;;  %v1563_v2 = vpack.c.bf16 %v1511_v59, %v1509_v63  ;;  %v1391_v6 = vadd.f32 %v1390_v60, %v3779_v25  ;;  %v3303_v63 = vld [vmem:[%s4067_s9 + $0x18] sm:$0xff]  }
 0x2ae   : > { %v1392_v0 = vpop.f32.mrf.mxu0  ;;  %3114 = vmatprep.subr.bf16.mxu0 %v3303_v63 }
 0x2af   : > { %v1564_v1 = vpack.c.bf16 %v1512_v62, %v1510_v61  ;;  %v1393_v4 = vadd.f32 %v1392_v0, %v3775_v35  ;;  %v1513_v13 = vmax.f32 %v1391_v6, 0.0  ;;  %3115 = vmatpush3.bf16.msra.mxu0 %v3303_v63 }
 0x2b0   : > { %v1394_v3 = vpop.f32.mrf.mxu0 }
 0x2b1   : > { %v1395_v5 = vadd.f32 %v1394_v3, %v3779_v25  ;;  %1792 = vmatprep.mubr.bf16.mxu1 %v1564_v1  ;;  %v1514_v11 = vmax.f32 %v1393_v4, 0.0 }
 0x2b2   : > { %v1396_v7 = vpop.f32.mrf.mxu0  ;;  %1793 = vmatmul.mubr.bf16.gmra.mxu1 %v1563_v2 }
 0x2b3   : > { %v1397_v8 = vadd.f32 %v1396_v7, %v3775_v35  ;;  %v1515_v9 = vmax.f32 %v1395_v5, 0.0  ;;  %v3304_v7 = vld [vmem:[%s4067_s9 + $0x10] sm:$0xff]  }
 0x2b4   : > { %v1400_v10 = vpop.f32.mrf.mxu0  ;;  %3116 = vmatprep.subr.bf16.mxu0 %v3304_v7 }
 0x2b5   : > { %v1516_v12 = vmax.f32 %v1397_v8, 0.0  ;;  %v1565_v16 = vpack.c.bf16 %v1515_v9, %v1513_v13  ;;  %v1401_v20 = vadd.f32 %v1400_v10, %v3779_v25  ;;  %3117 = vmatpush3.bf16.msra.mxu0 %v3304_v7 }
 0x2b6   : > { %v1402_v14 = vpop.f32.mrf.mxu0 }
 0x2b7   : > { %v1566_v15 = vpack.c.bf16 %v1516_v12, %v1514_v11  ;;  %v1403_v18 = vadd.f32 %v1402_v14, %v3775_v35  ;;  %v1517_v28 = vmax.f32 %v1401_v20, 0.0 }
 0x2b8   : > { %v1404_v17 = vpop.f32.mrf.mxu0 }
 0x2b9   : > { %v1405_v19 = vadd.f32 %v1404_v17, %v3779_v25  ;;  %1800 = vmatprep.mubr.bf16.mxu1 %v1566_v15  ;;  %v1518_v39 = vmax.f32 %v1403_v18, 0.0  ;;  %v3305_v15 = vld [vmem:[%s4067_s9 + $0x8] sm:$0xff]  }
 0x2ba   : > { %v1406_v21 = vpop.f32.mrf.mxu0  ;;  %1801 = vmatmul.mubr.bf16.gmra.mxu1 %v1565_v16  ;;  %3118 = vmatprep.subr.bf16.mxu0 %v3305_v15 }
 0x2bb   : > { %v1407_v22 = vadd.f32 %v1406_v21, %v3775_v35  ;;  %v1519_v23 = vmax.f32 %v1405_v19, 0.0  ;;  %3119 = vmatpush3.bf16.msra.mxu0 %v3305_v15 }
 0x2bc   : > { %v1410_v24 = vpop.f32.mrf.mxu0 }
 0x2bd   : > { %v1520_v26 = vmax.f32 %v1407_v22, 0.0  ;;  %v1567_v27 = vpack.c.bf16 %v1519_v23, %v1517_v28  ;;  %v1411_v38 = vadd.f32 %v1410_v24, %v3779_v25  ;;  %v3306_v23 = vld [vmem:[%s4067_s9] sm:$0xff]  }
 0x2be   : > { %v1412_v29 = vpop.f32.mrf.mxu0  ;;  %3120 = vmatprep.subr.bf16.mxu0 %v3306_v23 }
 0x2bf   : > { %v1568_v32 = vpack.c.bf16 %v1520_v26, %v1518_v39  ;;  %v1413_v36 = vadd.f32 %v1412_v29, %v3775_v35  ;;  %v1521_v46 = vmax.f32 %v1411_v38, 0.0  ;;  %3121 = vmatpush3.bf16.msra.mxu0 %v3306_v23 }
 0x2c0   : > { %v1414_v34 = vpop.f32.mrf.mxu0 }
 0x2c1   : > { %v1415_v37 = vadd.f32 %v1414_v34, %v3779_v25  ;;  %1808 = vmatprep.mubr.bf16.mxu1 %v1568_v32  ;;  %v1522_v44 = vmax.f32 %v1413_v36, 0.0 }
 0x2c2   : > { %v1416_v40 = vpop.f32.mrf.mxu0  ;;  %1809 = vmatmul.mubr.bf16.gmra.mxu1 %v1567_v27 }
 0x2c3   : > { %v1417_v41 = vadd.f32 %v1416_v40, %v3775_v35  ;;  %v1523_v42 = vmax.f32 %v1415_v37, 0.0 }
 0x2c4   : > { %v1420_v43 = vpop.f32.mrf.mxu0 }
 0x2c5   : > { %v1524_v45 = vmax.f32 %v1417_v41, 0.0  ;;  %v1569_v49 = vpack.c.bf16 %v1523_v42, %v1521_v46  ;;  %v1421_v53 = vadd.f32 %v1420_v43, %v3779_v25 }
 0x2c6   : > { %v1422_v47 = vpop.f32.mrf.mxu0 }
 0x2c7   : > { %v1570_v48 = vpack.c.bf16 %v1524_v45, %v1522_v44  ;;  %v1423_v51 = vadd.f32 %v1422_v47, %v3775_v35  ;;  %v1525_v60 = vmax.f32 %v1421_v53, 0.0 }
 0x2c8   : > { %v1424_v50 = vpop.f32.mrf.mxu0 }
 0x2c9   : > { %v1425_v52 = vadd.f32 %v1424_v50, %v3779_v25  ;;  %1816 = vmatprep.mubr.bf16.mxu1 %v1570_v48  ;;  %v1526_v58 = vmax.f32 %v1423_v51, 0.0 }
 0x2ca   : > { %v1426_v54 = vpop.f32.mrf.mxu0  ;;  %1817 = vmatmul.mubr.bf16.gmra.mxu1 %v1569_v49 }
 0x2cb   : > { %v1427_v55 = vadd.f32 %v1426_v54, %v3775_v35  ;;  %v1527_v56 = vmax.f32 %v1425_v52, 0.0 }
 0x2cc   : > { %v1430_v57 = vpop.f32.mrf.mxu0 }
 0x2cd   : > { %v1528_v59 = vmax.f32 %v1427_v55, 0.0  ;;  %v1571_v0 = vpack.c.bf16 %v1527_v56, %v1525_v60  ;;  %v1431_v4 = vadd.f32 %v1430_v57, %v3779_v25 }
 0x2ce   : > { %v1432_v61 = vpop.f32.mrf.mxu0 }
 0x2cf   : > { %v1572_v62 = vpack.c.bf16 %v1528_v59, %v1526_v58  ;;  %v1433_v2 = vadd.f32 %v1432_v61, %v3775_v35  ;;  %v1529_v12 = vmax.f32 %v1431_v4, 0.0 }
 0x2d0   : > { %v1434_v1 = vpop.f32.mrf.mxu0 }
 0x2d1   : > { %v1435_v3 = vadd.f32 %v1434_v1, %v3779_v25  ;;  %1824 = vmatprep.mubr.bf16.mxu1 %v1572_v62  ;;  %v1530_v10 = vmax.f32 %v1433_v2, 0.0 }
 0x2d2   : > { %v1436_v5 = vpop.f32.mrf.mxu0  ;;  %1825 = vmatmul.mubr.bf16.gmra.mxu1 %v1571_v0 }
 0x2d3   : > { %v1437_v6 = vadd.f32 %v1436_v5, %v3775_v35  ;;  %v1531_v8 = vmax.f32 %v1435_v3, 0.0 }
 0x2d4   : > { %v1440_v9 = vpop.f32.mrf.mxu0 }
 0x2d5   : > { %v1532_v11 = vmax.f32 %v1437_v6, 0.0  ;;  %v1573_v16 = vpack.c.bf16 %v1531_v8, %v1529_v12  ;;  %v1441_v20 = vadd.f32 %v1440_v9, %v3779_v25 }
 0x2d6   : > { %v1442_v13 = vpop.f32.mrf.mxu0 }
 0x2d7   : > { %v1574_v14 = vpack.c.bf16 %v1532_v11, %v1530_v10  ;;  %v1443_v18 = vadd.f32 %v1442_v13, %v3775_v35  ;;  %v1533_v29 = vmax.f32 %v1441_v20, 0.0 }
 0x2d8   : > { %v1444_v17 = vpop.f32.mrf.mxu0 }
 0x2d9   : > { %v1445_v19 = vadd.f32 %v1444_v17, %v3779_v25  ;;  %1832 = vmatprep.mubr.bf16.mxu1 %v1574_v14  ;;  %v1534_v26 = vmax.f32 %v1443_v18, 0.0 }
 0x2da   : > { %v1446_v21 = vpop.f32.mrf.mxu0  ;;  %1833 = vmatmul.mubr.bf16.gmra.mxu1 %v1573_v16 }
 0x2db   : > { %v1447_v22 = vadd.f32 %v1446_v21, %v3775_v35  ;;  %v1535_v24 = vmax.f32 %v1445_v19, 0.0 }
 0x2dc   : > { %v1450_v39 = vpop.f32.mrf.mxu0 }
 0x2dd   : > { %v1536_v28 = vmax.f32 %v1447_v22, 0.0  ;;  %v1575_v34 = vpack.c.bf16 %v1535_v24, %v1533_v29  ;;  %v1451_v40 = vadd.f32 %v1450_v39, %v3779_v25 }
 0x2de   : > { %v1452_v32 = vpop.f32.mrf.mxu0 }
 0x2df   : > { %v1576_v27 = vpack.c.bf16 %v1536_v28, %v1534_v26  ;;  %v1453_v37 = vadd.f32 %v1452_v32, %v3775_v35  ;;  %v1537_v47 = vmax.f32 %v1451_v40, 0.0 }
 0x2e0   : > { %v1454_v36 = vpop.f32.mrf.mxu0 }
 0x2e1   : > { %v1455_v38 = vadd.f32 %v1454_v36, %v3779_v25  ;;  %1840 = vmatprep.mubr.bf16.mxu1 %v1576_v27  ;;  %v1538_v45 = vmax.f32 %v1453_v37, 0.0  ;;  %v3872_v27 = vld [vmem:[%s4066_s8] ss:$0 sm:$0xff]  ;;  %v3307_v37 = vld [vmem:[%s4069_s11 + $0x18] sm:$0xff]  }
 0x2e2   : > { %v1456_v41 = vpop.f32.mrf.mxu0  ;;  %1841 = vmatmul.mubr.bf16.gmra.mxu1 %v1575_v34  ;;  %3154 = vmatprep.subr.bf16.mxu1 %v3307_v37 }
 0x2e3   : > { %v1457_v42 = vadd.f32 %v1456_v41, %v3775_v35  ;;  %v1539_v43 = vmax.f32 %v1455_v38, 0.0  ;;  %v3308_v38 = vld [vmem:[%s4069_s11 + $0x10] sm:$0xff]   ;;  %3155 = vmatpush3.bf16.msra.mxu1 %v3307_v37 }
 0x2e4   : > { %v1460_v44 = vpop.f32.mrf.mxu0  ;;  %3156 = vmatprep.subr.bf16.mxu1 %v3308_v38 }
 0x2e5   : > { %v1540_v46 = vmax.f32 %v1457_v42, 0.0  ;;  %v1577_v50 = vpack.c.bf16 %v1539_v43, %v1537_v47  ;;  %v1461_v54 = vadd.f32 %v1460_v44, %v3779_v25 }
 0x2e6   : > { %v1462_v48 = vpop.f32.mrf.mxu0 }
 0x2e7   : > { %v1578_v49 = vpack.c.bf16 %v1540_v46, %v1538_v45  ;;  %v1463_v52 = vadd.f32 %v1462_v48, %v3775_v35  ;;  %v1541_v61 = vmax.f32 %v1461_v54, 0.0  ;;  %3157 = vmatpush3.bf16.msra.mxu1 %v3308_v38 }
 0x2e8   : > { %v1464_v51 = vpop.f32.mrf.mxu0 }
 0x2e9   : > { %v1465_v53 = vadd.f32 %v1464_v51, %v3779_v25  ;;  %1848 = vmatprep.mubr.bf16.mxu1 %v1578_v49  ;;  %v1542_v59 = vmax.f32 %v1463_v52, 0.0 }
 0x2ea   : > { %v1466_v55 = vpop.f32.mrf.mxu0  ;;  %1849 = vmatmul.mubr.bf16.gmra.mxu1 %v1577_v50 }
 0x2eb   : > { %v1467_v56 = vadd.f32 %v1466_v55, %v3775_v35  ;;  %v1543_v57 = vmax.f32 %v1465_v53, 0.0 }
 0x2ec   : > { %v1470_v58 = vpop.f32.mrf.mxu0 }
 0x2ed   : > { %v1544_v60 = vmax.f32 %v1467_v56, 0.0  ;;  %v1579_v0 = vpack.c.bf16 %v1543_v57, %v1541_v61  ;;  %v1471_v4 = vadd.f32 %v1470_v58, %v3779_v25 }
 0x2ee   : > { %v1472_v62 = vpop.f32.mrf.mxu0 }
 0x2ef   : > { %v1580_v63 = vpack.c.bf16 %v1544_v60, %v1542_v59  ;;  %v1473_v2 = vadd.f32 %v1472_v62, %v3775_v35  ;;  %v1545_v11 = vmax.f32 %v1471_v4, 0.0 }
 0x2f0   : > { %v1474_v1 = vpop.f32.mrf.mxu0 }
 0x2f1   : > { %v1475_v3 = vadd.f32 %v1474_v1, %v3779_v25  ;;  %1856 = vmatprep.mubr.bf16.mxu1 %v1580_v63  ;;  %v1546_v9 = vmax.f32 %v1473_v2, 0.0 }
 0x2f2   : > { %v1476_v5 = vpop.f32.mrf.mxu0  ;;  %1857 = vmatmul.mubr.bf16.gmra.mxu1 %v1579_v0 }
 0x2f3   : > { %v1477_v6 = vadd.f32 %v1476_v5, %v3775_v35  ;;  %v1547_v7 = vmax.f32 %v1475_v3, 0.0 }
 0x2f4   : > { %v1480_v8 = vpop.f32.mrf.mxu0 }
 0x2f5   : > { %v1548_v10 = vmax.f32 %v1477_v6, 0.0  ;;  %v1581_v14 = vpack.c.bf16 %v1547_v7, %v1545_v11  ;;  %v1481_v18 = vadd.f32 %v1480_v8, %v3779_v25 }
 0x2f6   : > { %v1482_v12 = vpop.f32.mrf.mxu0 }
 0x2f7   : > { %v1582_v13 = vpack.c.bf16 %v1548_v10, %v1546_v9  ;;  %v1483_v16 = vadd.f32 %v1482_v12, %v3775_v35  ;;  %v1549_v24 = vmax.f32 %v1481_v18, 0.0 }
 0x2f8   : > { %v1484_v15 = vpop.f32.mrf.mxu0 }
 0x2f9   : > { %v1485_v17 = vadd.f32 %v1484_v15, %v3779_v25  ;;  %1864 = vmatprep.mubr.bf16.mxu1 %v1582_v13  ;;  %v1550_v22 = vmax.f32 %v1483_v16, 0.0 }
 0x2fa   : > { %v1486_v19 = vpop.f32.mrf.mxu0  ;;  %1865 = vmatmul.mubr.bf16.gmra.mxu1 %v1581_v14 }
 0x2fb   : > { %v1487_v20 = vadd.f32 %v1486_v19, %v3775_v35  ;;  %v1551_v21 = vmax.f32 %v1485_v17, 0.0 }
 0x2fd   : > { %v1552_v23 = vmax.f32 %v1487_v20, 0.0  ;;  %v1583_v26 = vpack.c.bf16 %v1551_v21, %v1549_v24 }
 0x2ff   : > { %v1584_v39 = vpack.c.bf16 %v1552_v23, %v1550_v22 }
 0x301   : > { %1872 = vmatprep.mubr.bf16.mxu1 %v1584_v39 }
 0x302   : > { %1873 = vmatmul.mubr.bf16.gmra.mxu1 %v1583_v26 }
 0x34a   : > { %v2890_v28 = vpop.f32.mrf.mxu1 }
 0x34c   : > { %v2891_v29 = vpop.f32.mrf.mxu1 }
 0x34d   : > { %v2892_v32 = vadd.f32 %v2891_v29, %v2890_v28 }
 0x34e   : > { %v2893_v25 = vpop.f32.mrf.mxu1 }
 0x34f   : > { %v1755_v35 = vadd.f32 %v2892_v32, %v3872_v27 }
 0x350   : > { %v2894_v34 = vpop.f32.mrf.mxu1 }
 0x351   : > { %v2895_v36 = vadd.f32 %v2894_v34, %v2893_v25  ;;  %v1881_v43 = vmax.f32 %v1755_v35, 0.0 }
 0x352   : > { %v2896_v40 = vpop.f32.mrf.mxu1 }
 0x353   : > { %v1758_v41 = vadd.f32 %v2895_v36, %v3872_v27 }
 0x354   : > { %v2897_v42 = vpop.f32.mrf.mxu1 }
 0x355   : > { %v1882_v44 = vmax.f32 %v1758_v41, 0.0  ;;  %v2898_v45 = vadd.f32 %v2897_v42, %v2896_v40 }
 0x356   : > { %v2899_v46 = vpop.f32.mrf.mxu1 }
 0x357   : > { %v1913_v47 = vpack.c.bf16 %v1882_v44, %v1881_v43  ;;  %v1763_v49 = vadd.f32 %v2898_v45, %v3872_v27 }
 0x358   : > { %v2900_v48 = vpop.f32.mrf.mxu1 }
 0x359   : > { %v2901_v50 = vadd.f32 %v2900_v48, %v2899_v46  ;;  %3122 = vmatprep.mubr.bf16.mxu0 %v1913_v47  ;;  %v1883_v54 = vmax.f32 %v1763_v49, 0.0 }
 0x35a   : > { %v2902_v51 = vpop.f32.mrf.mxu1 }
 0x35b   : > { %v1766_v52 = vadd.f32 %v2901_v50, %v3872_v27 }
 0x35c   : > { %v2903_v53 = vpop.f32.mrf.mxu1 }
 0x35d   : > { %v1884_v55 = vmax.f32 %v1766_v52, 0.0  ;;  %v2904_v56 = vadd.f32 %v2903_v53, %v2902_v51 }
 0x35e   : > { %v2905_v57 = vpop.f32.mrf.mxu1 }
 0x35f   : > { %v1914_v58 = vpack.c.bf16 %v1884_v55, %v1883_v54  ;;  %v1771_v60 = vadd.f32 %v2904_v56, %v3872_v27 }
 0x360   : > { %v2906_v59 = vpop.f32.mrf.mxu1 }
 0x361   : > { %v2907_v61 = vadd.f32 %v2906_v59, %v2905_v57  ;;  %3123 = vmatmul.mubr.bf16.vlgmr.msra.gmra.mxu0 %v1914_v58  ;;  %v1885_v1 = vmax.f32 %v1771_v60, 0.0 }
 0x362   : > { %v2908_v62 = vpop.f32.mrf.mxu1 }
 0x363   : > { %v1774_v63 = vadd.f32 %v2907_v61, %v3872_v27 }
 0x364   : > { %v2909_v0 = vpop.f32.mrf.mxu1 }
 0x365   : > { %v1886_v2 = vmax.f32 %v1774_v63, 0.0  ;;  %v2910_v3 = vadd.f32 %v2909_v0, %v2908_v62 }
 0x366   : > { %v2911_v4 = vpop.f32.mrf.mxu1 }
 0x367   : > { %v1915_v5 = vpack.c.bf16 %v1886_v2, %v1885_v1  ;;  %v1779_v7 = vadd.f32 %v2910_v3, %v3872_v27 }
 0x368   : > { %v2912_v6 = vpop.f32.mrf.mxu1 }
 0x369   : > { %v2913_v8 = vadd.f32 %v2912_v6, %v2911_v4  ;;  %3126 = vmatprep.mubr.bf16.mxu0 %v1915_v5  ;;  %v1887_v12 = vmax.f32 %v1779_v7, 0.0 }
 0x36a   : > { %v2914_v9 = vpop.f32.mrf.mxu1 }
 0x36b   : > { %v1782_v10 = vadd.f32 %v2913_v8, %v3872_v27 }
 0x36c   : > { %v2915_v11 = vpop.f32.mrf.mxu1 }
 0x36d   : > { %v1888_v13 = vmax.f32 %v1782_v10, 0.0  ;;  %v2916_v14 = vadd.f32 %v2915_v11, %v2914_v9 }
 0x36e   : > { %v2917_v15 = vpop.f32.mrf.mxu1 }
 0x36f   : > { %v1916_v16 = vpack.c.bf16 %v1888_v13, %v1887_v12  ;;  %v1787_v18 = vadd.f32 %v2916_v14, %v3872_v27 }
 0x370   : > { %v2918_v17 = vpop.f32.mrf.mxu1 }
 0x371   : > { %v2919_v19 = vadd.f32 %v2918_v17, %v2917_v15  ;;  %3127 = vmatmul.mubr.bf16.gmra.mxu0 %v1916_v16  ;;  %v1889_v23 = vmax.f32 %v1787_v18, 0.0 }
 0x372   : > { %v2920_v20 = vpop.f32.mrf.mxu1 }
 0x373   : > { %v1790_v21 = vadd.f32 %v2919_v19, %v3872_v27 }
 0x374   : > { %v2921_v22 = vpop.f32.mrf.mxu1 }
 0x375   : > { %v1890_v24 = vmax.f32 %v1790_v21, 0.0  ;;  %v2922_v39 = vadd.f32 %v2921_v22, %v2920_v20 }
 0x376   : > { %v2923_v26 = vpop.f32.mrf.mxu1 }
 0x377   : > { %v1917_v28 = vpack.c.bf16 %v1890_v24, %v1889_v23  ;;  %v1795_v32 = vadd.f32 %v2922_v39, %v3872_v27 }
 0x378   : > { %v2924_v29 = vpop.f32.mrf.mxu1 }
 0x379   : > { %v2925_v25 = vadd.f32 %v2924_v29, %v2923_v26  ;;  %3130 = vmatprep.mubr.bf16.mxu0 %v1917_v28  ;;  %v1891_v37 = vmax.f32 %v1795_v32, 0.0 }
 0x37a   : > { %v2926_v34 = vpop.f32.mrf.mxu1 }
 0x37b   : > { %v1798_v35 = vadd.f32 %v2925_v25, %v3872_v27 }
 0x37c   : > { %v2927_v36 = vpop.f32.mrf.mxu1 }
 0x37d   : > { %v1892_v38 = vmax.f32 %v1798_v35, 0.0  ;;  %v2928_v40 = vadd.f32 %v2927_v36, %v2926_v34  ;;  %v3309_v35 = vld [vmem:[%s4069_s11 + $0x8] sm:$0xff]  }
 0x37e   : > { %v2929_v41 = vpop.f32.mrf.mxu1  ;;  %3158 = vmatprep.subr.bf16.mxu1 %v3309_v35 }
 0x37f   : > { %v1918_v42 = vpack.c.bf16 %v1892_v38, %v1891_v37  ;;  %v1803_v44 = vadd.f32 %v2928_v40, %v3872_v27  ;;  %3159 = vmatpush3.bf16.msra.mxu1 %v3309_v35 }
 0x380   : > { %v2930_v43 = vpop.f32.mrf.mxu1 }
 0x381   : > { %v2931_v45 = vadd.f32 %v2930_v43, %v2929_v41  ;;  %3131 = vmatmul.mubr.bf16.gmra.mxu0 %v1918_v42  ;;  %v1893_v49 = vmax.f32 %v1803_v44, 0.0  ;;  %v3310_v42 = vld [vmem:[%s4069_s11] sm:$0xff]  }
 0x382   : > { %v2932_v46 = vpop.f32.mrf.mxu1  ;;  %3160 = vmatprep.subr.bf16.mxu1 %v3310_v42 }
 0x383   : > { %v1806_v47 = vadd.f32 %v2931_v45, %v3872_v27  ;;  %3161 = vmatpush3.bf16.msra.mxu1 %v3310_v42 }
 0x384   : > { %v2933_v48 = vpop.f32.mrf.mxu1 }
 0x385   : > { %v1894_v50 = vmax.f32 %v1806_v47, 0.0  ;;  %v2934_v51 = vadd.f32 %v2933_v48, %v2932_v46 }
 0x386   : > { %v2935_v52 = vpop.f32.mrf.mxu1 }
 0x387   : > { %v1919_v53 = vpack.c.bf16 %v1894_v50, %v1893_v49  ;;  %v1811_v55 = vadd.f32 %v2934_v51, %v3872_v27 }
 0x388   : > { %v2936_v54 = vpop.f32.mrf.mxu1 }
 0x389   : > { %v2937_v56 = vadd.f32 %v2936_v54, %v2935_v52  ;;  %3134 = vmatprep.mubr.bf16.mxu0 %v1919_v53  ;;  %v1895_v60 = vmax.f32 %v1811_v55, 0.0 }
 0x38a   : > { %v2938_v57 = vpop.f32.mrf.mxu1 }
 0x38b   : > { %v1814_v58 = vadd.f32 %v2937_v56, %v3872_v27 }
 0x38c   : > { %v2939_v59 = vpop.f32.mrf.mxu1 }
 0x38d   : > { %v1896_v61 = vmax.f32 %v1814_v58, 0.0  ;;  %v2940_v62 = vadd.f32 %v2939_v59, %v2938_v57 }
 0x38e   : > { %v2941_v63 = vpop.f32.mrf.mxu1 }
 0x38f   : > { %v1920_v0 = vpack.c.bf16 %v1896_v61, %v1895_v60  ;;  %v1819_v2 = vadd.f32 %v2940_v62, %v3872_v27 }
 0x390   : > { %v2942_v1 = vpop.f32.mrf.mxu1 }
 0x391   : > { %v2943_v3 = vadd.f32 %v2942_v1, %v2941_v63  ;;  %3135 = vmatmul.mubr.bf16.gmra.mxu0 %v1920_v0  ;;  %v1897_v7 = vmax.f32 %v1819_v2, 0.0 }
 0x392   : > { %v2944_v4 = vpop.f32.mrf.mxu1 }
 0x393   : > { %v1822_v5 = vadd.f32 %v2943_v3, %v3872_v27 }
 0x394   : > { %v2945_v6 = vpop.f32.mrf.mxu1 }
 0x395   : > { %v1898_v8 = vmax.f32 %v1822_v5, 0.0  ;;  %v2946_v9 = vadd.f32 %v2945_v6, %v2944_v4 }
 0x396   : > { %v2947_v10 = vpop.f32.mrf.mxu1 }
 0x397   : > { %v1921_v11 = vpack.c.bf16 %v1898_v8, %v1897_v7  ;;  %v1827_v13 = vadd.f32 %v2946_v9, %v3872_v27 }
 0x398   : > { %v2948_v12 = vpop.f32.mrf.mxu1 }
 0x399   : > { %v2949_v14 = vadd.f32 %v2948_v12, %v2947_v10  ;;  %3138 = vmatprep.mubr.bf16.mxu0 %v1921_v11  ;;  %v1899_v18 = vmax.f32 %v1827_v13, 0.0 }
 0x39a   : > { %v2950_v15 = vpop.f32.mrf.mxu1 }
 0x39b   : > { %v1830_v16 = vadd.f32 %v2949_v14, %v3872_v27 }
 0x39c   : > { %v2951_v17 = vpop.f32.mrf.mxu1 }
 0x39d   : > { %v1900_v19 = vmax.f32 %v1830_v16, 0.0  ;;  %v2952_v20 = vadd.f32 %v2951_v17, %v2950_v15 }
 0x39e   : > { %v2953_v21 = vpop.f32.mrf.mxu1 }
 0x39f   : > { %v1922_v22 = vpack.c.bf16 %v1900_v19, %v1899_v18  ;;  %v1835_v24 = vadd.f32 %v2952_v20, %v3872_v27 }
 0x3a0   : > { %v2954_v23 = vpop.f32.mrf.mxu1 }
 0x3a1   : > { %v2955_v39 = vadd.f32 %v2954_v23, %v2953_v21  ;;  %3139 = vmatmul.mubr.bf16.gmra.mxu0 %v1922_v22  ;;  %v1901_v32 = vmax.f32 %v1835_v24, 0.0 }
 0x3a2   : > { %v2956_v26 = vpop.f32.mrf.mxu1 }
 0x3a3   : > { %v1838_v28 = vadd.f32 %v2955_v39, %v3872_v27 }
 0x3a4   : > { %v2957_v29 = vpop.f32.mrf.mxu1 }
 0x3a5   : > { %v1902_v25 = vmax.f32 %v1838_v28, 0.0  ;;  %v2958_v34 = vadd.f32 %v2957_v29, %v2956_v26  ;;  %v2547_v28 = vld [vmem:[%s4071_s13 + $0x10] sm:$0xff] }
 0x3a6   : > { %v2959_v36 = vpop.f32.mrf.mxu1  ;;  %2561 = vperm.xlu1 %3236, %v2547_v28  }
 0x3a7   : > { %v1923_v37 = vpack.c.bf16 %v1902_v25, %v1901_v32  ;;  %v1843_v40 = vadd.f32 %v2958_v34, %v3872_v27  ;;  %v2548_v32 = vld [vmem:[%s4071_s13 + $0x18] sm:$0xff]  ;;  %v3927_v34 = vld [vmem:[%s4068_s10] ss:$0 sm:$0xff] }
 0x3a8   : > { %v2960_v38 = vpop.f32.mrf.mxu1 }
 0x3a9   : > { %v2961_v41 = vadd.f32 %v2960_v38, %v2959_v36  ;;  %3142 = vmatprep.mubr.bf16.mxu0 %v1923_v37  ;;  %v1903_v46 = vmax.f32 %v1843_v40, 0.0 }
 0x3aa   : > { %v2962_v43 = vpop.f32.mrf.mxu1  ;;  %2566 = vperm.xlu1 %3236, %v2548_v32  }
 0x3ab   : > { %v1846_v44 = vadd.f32 %v2961_v41, %v3872_v27 }
 0x3ac   : > { %v2963_v45 = vpop.f32.mrf.mxu1 }
 0x3ad   : > { %v1904_v47 = vmax.f32 %v1846_v44, 0.0  ;;  %v2964_v48 = vadd.f32 %v2963_v45, %v2962_v43 }
 0x3ae   : > { %v2965_v49 = vpop.f32.mrf.mxu1 }
 0x3af   : > { %v1924_v50 = vpack.c.bf16 %v1904_v47, %v1903_v46  ;;  %v1851_v52 = vadd.f32 %v2964_v48, %v3872_v27 }
 0x3b0   : > { %v2966_v51 = vpop.f32.mrf.mxu1 }
 0x3b1   : > { %v2967_v53 = vadd.f32 %v2966_v51, %v2965_v49  ;;  %3143 = vmatmul.mubr.bf16.gmra.mxu0 %v1924_v50  ;;  %v1905_v57 = vmax.f32 %v1851_v52, 0.0 }
 0x3b2   : > { %v2968_v54 = vpop.f32.mrf.mxu1 }
 0x3b3   : > { %v1854_v55 = vadd.f32 %v2967_v53, %v3872_v27 }
 0x3b4   : > { %v2969_v56 = vpop.f32.mrf.mxu1 }
 0x3b5   : > { %v1906_v58 = vmax.f32 %v1854_v55, 0.0  ;;  %v2970_v59 = vadd.f32 %v2969_v56, %v2968_v54 }
 0x3b6   : > { %v2971_v60 = vpop.f32.mrf.mxu1 }
 0x3b7   : > { %v1925_v61 = vpack.c.bf16 %v1906_v58, %v1905_v57  ;;  %v1859_v63 = vadd.f32 %v2970_v59, %v3872_v27 }
 0x3b8   : > { %v2972_v62 = vpop.f32.mrf.mxu1 }
 0x3b9   : > { %v2973_v0 = vadd.f32 %v2972_v62, %v2971_v60  ;;  %3146 = vmatprep.mubr.bf16.mxu0 %v1925_v61  ;;  %v1907_v4 = vmax.f32 %v1859_v63, 0.0 }
 0x3ba   : > { %v2974_v1 = vpop.f32.mrf.mxu1 }
 0x3bb   : > { %v1862_v2 = vadd.f32 %v2973_v0, %v3872_v27 }
 0x3bc   : > { %v2975_v3 = vpop.f32.mrf.mxu1 }
 0x3bd   : > { %v1908_v5 = vmax.f32 %v1862_v2, 0.0  ;;  %v2976_v6 = vadd.f32 %v2975_v3, %v2974_v1 }
 0x3be   : > { %v2977_v7 = vpop.f32.mrf.mxu1 }
 0x3bf   : > { %v1926_v8 = vpack.c.bf16 %v1908_v5, %v1907_v4  ;;  %v1867_v10 = vadd.f32 %v2976_v6, %v3872_v27 }
 0x3c0   : > { %v2978_v9 = vpop.f32.mrf.mxu1 }
 0x3c1   : > { %v2979_v11 = vadd.f32 %v2978_v9, %v2977_v7  ;;  %3147 = vmatmul.mubr.bf16.gmra.mxu0 %v1926_v8  ;;  %v1909_v15 = vmax.f32 %v1867_v10, 0.0 }
 0x3c2   : > { %v2980_v12 = vpop.f32.mrf.mxu1 }
 0x3c3   : > { %v1870_v13 = vadd.f32 %v2979_v11, %v3872_v27 }
 0x3c4   : > { %v2981_v14 = vpop.f32.mrf.mxu1 }
 0x3c5   : > { %v1910_v16 = vmax.f32 %v1870_v13, 0.0  ;;  %v2982_v17 = vadd.f32 %v2981_v14, %v2980_v12 }
 0x3c6   : > { %v2983_v18 = vpop.f32.mrf.mxu1 }
 0x3c7   : > { %v1927_v19 = vpack.c.bf16 %v1910_v16, %v1909_v15  ;;  %v1875_v21 = vadd.f32 %v2982_v17, %v3872_v27 }
 0x3c8   : > { %v2984_v20 = vpop.f32.mrf.mxu1 }
 0x3c9   : > { %v2985_v22 = vadd.f32 %v2984_v20, %v2983_v18  ;;  %3150 = vmatprep.mubr.bf16.mxu0 %v1927_v19  ;;  %v1911_v24 = vmax.f32 %v1875_v21, 0.0 }
 0x3cb   : > { %v1878_v23 = vadd.f32 %v2985_v22, %v3872_v27 }
 0x3cd   : > { %v1912_v39 = vmax.f32 %v1878_v23, 0.0 }
 0x3cf   : > { %v1928_v26 = vpack.c.bf16 %v1912_v39, %v1911_v24 }
 0x3d1   : > { %3151 = vmatmul.mubr.bf16.gmra.mxu0 %v1928_v26 }
 0x421   : > { %v3124_v29 = vpop.f32.mrf.mxu0 }
 0x422   : > { %v2043_v37 = vadd.f32 %v3124_v29, %v3927_v34 }
 0x423   : > { %v2034_v25 = vpop.f32.mrf.mxu0 }
 0x424   : > { %v2035_v35 = vadd.f32 %v3927_v34, %v2034_v25  ;;  %v2163_v44 = vmax.f32 %v2043_v37, 0.0 }
 0x425   : > { %v3125_v27 = vpop.f32.mrf.mxu0 }
 0x426   : > { %v2046_v36 = vadd.f32 %v3125_v27, %v3927_v34  ;;  %v2161_v42 = vmax.f32 %v2035_v35, 0.0 }
 0x427   : > { %v2037_v38 = vpop.f32.mrf.mxu0 }
 0x428   : > { %v2038_v40 = vadd.f32 %v3927_v34, %v2037_v38  ;;  %v2164_v41 = vmax.f32 %v2046_v36, 0.0 }
 0x42a   : > { %v2162_v43 = vmax.f32 %v2038_v40, 0.0  ;;  %v2194_v46 = vpack.c.bf16 %v2164_v41, %v2163_v44 }
 0x42c   : > { %v2193_v45 = vpack.c.bf16 %v2162_v43, %v2161_v42 }
 0x42e   : > { %3162 = vmatprep.mubr.msk.bf16.mxu1 %vm930_vm1, %v2193_v45 }
 0x42f   : > { %3163 = vmatmul.mubr.msk.bf16.vlgmr.msra.gmra.mxu1 %vm930_vm1, %v2194_v46 }
 0x431   : > { %v3128_v47 = vpop.f32.mrf.mxu0 }
 0x432   : > { %v2059_v52 = vadd.f32 %v3128_v47, %v3927_v34 }
 0x433   : > { %v2050_v48 = vpop.f32.mrf.mxu0 }
 0x434   : > { %v2051_v50 = vadd.f32 %v3927_v34, %v2050_v48  ;;  %v2167_v58 = vmax.f32 %v2059_v52, 0.0 }
 0x435   : > { %v3129_v49 = vpop.f32.mrf.mxu0 }
 0x436   : > { %v2062_v51 = vadd.f32 %v3129_v49, %v3927_v34  ;;  %v2165_v56 = vmax.f32 %v2051_v50, 0.0 }
 0x437   : > { %v2053_v53 = vpop.f32.mrf.mxu0 }
 0x438   : > { %v2054_v54 = vadd.f32 %v3927_v34, %v2053_v53  ;;  %v2168_v55 = vmax.f32 %v2062_v51, 0.0 }
 0x43a   : > { %v2166_v57 = vmax.f32 %v2054_v54, 0.0  ;;  %v2196_v60 = vpack.c.bf16 %v2168_v55, %v2167_v58 }
 0x43c   : > { %v2195_v59 = vpack.c.bf16 %v2166_v57, %v2165_v56 }
 0x43e   : > { %3166 = vmatprep.mubr.msk.bf16.mxu1 %vm930_vm1, %v2195_v59 }
 0x43f   : > { %3167 = vmatmul.mubr.msk.bf16.gmra.mxu1 %vm930_vm1, %v2196_v60 }
 0x441   : > { %v3132_v61 = vpop.f32.mrf.mxu0 }
 0x442   : > { %v2075_v2 = vadd.f32 %v3132_v61, %v3927_v34 }
 0x443   : > { %v2066_v62 = vpop.f32.mrf.mxu0 }
 0x444   : > { %v2067_v0 = vadd.f32 %v3927_v34, %v2066_v62  ;;  %v2171_v8 = vmax.f32 %v2075_v2, 0.0 }
 0x445   : > { %v3133_v63 = vpop.f32.mrf.mxu0 }
 0x446   : > { %v2078_v1 = vadd.f32 %v3133_v63, %v3927_v34  ;;  %v2169_v6 = vmax.f32 %v2067_v0, 0.0 }
 0x447   : > { %v2069_v3 = vpop.f32.mrf.mxu0 }
 0x448   : > { %v2070_v4 = vadd.f32 %v3927_v34, %v2069_v3  ;;  %v2172_v5 = vmax.f32 %v2078_v1, 0.0 }
 0x44a   : > { %v2170_v7 = vmax.f32 %v2070_v4, 0.0  ;;  %v2198_v10 = vpack.c.bf16 %v2172_v5, %v2171_v8 }
 0x44c   : > { %v2197_v9 = vpack.c.bf16 %v2170_v7, %v2169_v6 }
 0x44e   : > { %3170 = vmatprep.mubr.msk.bf16.mxu1 %vm930_vm1, %v2197_v9 }
 0x44f   : > { %3171 = vmatmul.mubr.msk.bf16.gmra.mxu1 %vm930_vm1, %v2198_v10  ;;  %v2545_v10 = vld [vmem:[%s4071_s13] sm:$0xff] }
 0x450   : > { %2551 = vperm.xlu0 %3235, %v2545_v10  }
 0x451   : > { %v3136_v11 = vpop.f32.mrf.mxu0 }
 0x452   : > { %v2091_v16 = vadd.f32 %v3136_v11, %v3927_v34 }
 0x453   : > { %v2082_v12 = vpop.f32.mrf.mxu0 }
 0x454   : > { %v2083_v14 = vadd.f32 %v3927_v34, %v2082_v12  ;;  %v2175_v22 = vmax.f32 %v2091_v16, 0.0 }
 0x455   : > { %v3137_v13 = vpop.f32.mrf.mxu0 }
 0x456   : > { %v2094_v15 = vadd.f32 %v3137_v13, %v3927_v34  ;;  %v2173_v20 = vmax.f32 %v2083_v14, 0.0 }
 0x457   : > { %v2085_v17 = vpop.f32.mrf.mxu0 }
 0x458   : > { %v2086_v18 = vadd.f32 %v3927_v34, %v2085_v17  ;;  %v2176_v19 = vmax.f32 %v2094_v15, 0.0  ;;  %v2546_v17 = vld [vmem:[%s4071_s13 + $0x8] sm:$0xff] }
 0x459   : > { %2556 = vperm.xlu0 %3235, %v2546_v17  }
 0x45a   : > { %v2174_v21 = vmax.f32 %v2086_v18, 0.0  ;;  %v2200_v24 = vpack.c.bf16 %v2176_v19, %v2175_v22  ;;  %v2595_v22 = vld [vmem:[#allocation2] sm:$0x1] }
 0x45c   : > { %v2199_v23 = vpack.c.bf16 %v2174_v21, %v2173_v20 }
 0x45d   : > { %2598 = vperm.xlu0 %3235, %v2595_v22  }
 0x45e   : > { %3174 = vmatprep.mubr.msk.bf16.mxu1 %vm930_vm1, %v2199_v23 }
 0x45f   : > { %3175 = vmatmul.mubr.msk.bf16.gmra.mxu1 %vm930_vm1, %v2200_v24 }
 0x461   : > { %v3140_v39 = vpop.f32.mrf.mxu0 }
 0x462   : > { %v2107_v25 = vadd.f32 %v3140_v39, %v3927_v34 }
 0x463   : > { %v2098_v26 = vpop.f32.mrf.mxu0 }
 0x464   : > { %v2099_v29 = vadd.f32 %v3927_v34, %v2098_v26  ;;  %v2179_v40 = vmax.f32 %v2107_v25, 0.0 }
 0x465   : > { %v3141_v28 = vpop.f32.mrf.mxu0 }
 0x466   : > { %v2110_v32 = vadd.f32 %v3141_v28, %v3927_v34  ;;  %v2177_v37 = vmax.f32 %v2099_v29, 0.0 }
 0x467   : > { %v2101_v27 = vpop.f32.mrf.mxu0 }
 0x468   : > { %v2102_v35 = vadd.f32 %v3927_v34, %v2101_v27  ;;  %v2180_v36 = vmax.f32 %v2110_v32, 0.0 }
 0x46a   : > { %v2178_v38 = vmax.f32 %v2102_v35, 0.0  ;;  %v2202_v42 = vpack.c.bf16 %v2180_v36, %v2179_v40 }
 0x46c   : > { %v2201_v41 = vpack.c.bf16 %v2178_v38, %v2177_v37 }
 0x46e   : > { %3178 = vmatprep.mubr.msk.bf16.mxu1 %vm930_vm1, %v2201_v41 }
 0x46f   : > { %3179 = vmatmul.mubr.msk.bf16.gmra.mxu1 %vm930_vm1, %v2202_v42 }
 0x471   : > { %v3144_v43 = vpop.f32.mrf.mxu0 }
 0x472   : > { %v2123_v48 = vadd.f32 %v3144_v43, %v3927_v34 }
 0x473   : > { %v2114_v44 = vpop.f32.mrf.mxu0 }
 0x474   : > { %v2115_v46 = vadd.f32 %v3927_v34, %v2114_v44  ;;  %v2183_v54 = vmax.f32 %v2123_v48, 0.0 }
 0x475   : > { %v3145_v45 = vpop.f32.mrf.mxu0 }
 0x476   : > { %v2126_v47 = vadd.f32 %v3145_v45, %v3927_v34  ;;  %v2181_v52 = vmax.f32 %v2115_v46, 0.0 }
 0x477   : > { %v2117_v49 = vpop.f32.mrf.mxu0 }
 0x478   : > { %v2118_v50 = vadd.f32 %v3927_v34, %v2117_v49  ;;  %v2184_v51 = vmax.f32 %v2126_v47, 0.0 }
 0x47a   : > { %v2182_v53 = vmax.f32 %v2118_v50, 0.0  ;;  %v2204_v56 = vpack.c.bf16 %v2184_v51, %v2183_v54 }
 0x47c   : > { %v2203_v55 = vpack.c.bf16 %v2182_v53, %v2181_v52 }
 0x47e   : > { %3182 = vmatprep.mubr.msk.bf16.mxu1 %vm930_vm1, %v2203_v55 }
 0x47f   : > { %3183 = vmatmul.mubr.msk.bf16.gmra.mxu1 %vm930_vm1, %v2204_v56 }
 0x481   : > { %v3148_v57 = vpop.f32.mrf.mxu0 }
 0x482   : > { %v2139_v62 = vadd.f32 %v3148_v57, %v3927_v34 }
 0x483   : > { %v2130_v58 = vpop.f32.mrf.mxu0 }
 0x484   : > { %v2131_v60 = vadd.f32 %v3927_v34, %v2130_v58  ;;  %v2187_v4 = vmax.f32 %v2139_v62, 0.0 }
 0x485   : > { %v3149_v59 = vpop.f32.mrf.mxu0 }
 0x486   : > { %v2142_v61 = vadd.f32 %v3149_v59, %v3927_v34  ;;  %v2185_v2 = vmax.f32 %v2131_v60, 0.0 }
 0x487   : > { %v2133_v63 = vpop.f32.mrf.mxu0 }
 0x488   : > { %v2134_v0 = vadd.f32 %v3927_v34, %v2133_v63  ;;  %v2188_v1 = vmax.f32 %v2142_v61, 0.0 }
 0x48a   : > { %v2186_v3 = vmax.f32 %v2134_v0, 0.0  ;;  %v2206_v6 = vpack.c.bf16 %v2188_v1, %v2187_v4 }
 0x48c   : > { %v2205_v5 = vpack.c.bf16 %v2186_v3, %v2185_v2 }
 0x48e   : > { %3186 = vmatprep.mubr.msk.bf16.mxu1 %vm930_vm1, %v2205_v5 }
 0x48f   : > { %3187 = vmatmul.mubr.msk.bf16.gmra.mxu1 %vm930_vm1, %v2206_v6 }
 0x491   : > { %v3152_v7 = vpop.f32.mrf.mxu0 }
 0x492   : > { %v2155_v13 = vadd.f32 %v3152_v7, %v3927_v34 }
 0x493   : > { %v2146_v8 = vpop.f32.mrf.mxu0 }
 0x494   : > { %v2147_v11 = vadd.f32 %v3927_v34, %v2146_v8  ;;  %v2191_v20 = vmax.f32 %v2155_v13, 0.0 }
 0x495   : > { %v3153_v9 = vpop.f32.mrf.mxu0 }
 0x496   : > { %v2158_v12 = vadd.f32 %v3153_v9, %v3927_v34  ;;  %v2189_v18 = vmax.f32 %v2147_v11, 0.0 }
 0x497   : > { %v2149_v14 = vpop.f32.mrf.mxu0 }
 0x498   : > { %v2150_v15 = vadd.f32 %v3927_v34, %v2149_v14  ;;  %v2192_v16 = vmax.f32 %v2158_v12, 0.0  ;;  %v3986_v34 = vld [vmem:[%s4070_s12] ss:$0 sm:$0xff] }
 0x49a   : > { %v2190_v19 = vmax.f32 %v2150_v15, 0.0  ;;  %v2208_v23 = vpack.c.bf16 %v2192_v16, %v2191_v20 }
 0x49c   : > { %v2207_v21 = vpack.c.bf16 %v2190_v19, %v2189_v18 }
 0x49e   : > { %3190 = vmatprep.mubr.msk.bf16.mxu1 %vm930_vm1, %v2207_v21 }
 0x49f   : > { %3191 = vmatmul.mubr.msk.bf16.gmra.mxu1 %vm930_vm1, %v2208_v23 }
 0x4ef   : > { %v3164_v24 = vpop.f32.mrf.mxu1 }
 0x4f0   : > { %v2339_v27 = vadd.f32 %v3164_v24, %v3986_v34 }
 0x4f1   : > { %v2330_v39 = vpop.f32.mrf.mxu1 }
 0x4f2   : > { %v2331_v28 = vadd.f32 %v3986_v34, %v2330_v39  ;;  %v2459_v40 = vmax.f32 %v2339_v27, 0.0 }
 0x4f3   : > { %v3165_v26 = vpop.f32.mrf.mxu1 }
 0x4f4   : > { %v2342_v32 = vadd.f32 %v3165_v26, %v3986_v34  ;;  %v2457_v35 = vmax.f32 %v2331_v28, 0.0 }
 0x4f5   : > { %v2333_v29 = vpop.f32.mrf.mxu1 }
 0x4f6   : > { %v2334_v25 = vadd.f32 %v3986_v34, %v2333_v29  ;;  %v2460_v37 = vmax.f32 %v2342_v32, 0.0 }
 0x4f8   : > { %v2458_v36 = vmax.f32 %v2334_v25, 0.0  ;;  %v2490_v41 = vpack.c.bf16 %v2460_v37, %v2459_v40 }
 0x4fa   : > { %v2489_v38 = vpack.c.bf16 %v2458_v36, %v2457_v35 }
 0x4fc   : > { %2505 = vxpose.xlu1.c.b16.start [1/8] (narrow) %v2489_v38, 32 }
 0x4ff   : > { %v3168_v42 = vpop.f32.mrf.mxu1 }
 0x500   : > { %2506 = vxpose.xlu1.c.b16.cont [2/8] (narrow) %v2490_v41, 32  ;;  %v2355_v49 = vadd.f32 %v3168_v42, %v3986_v34 }
 0x501   : > { %v2346_v43 = vpop.f32.mrf.mxu1 }
 0x502   : > { %v2347_v45 = vadd.f32 %v3986_v34, %v2346_v43  ;;  %v2463_v54 = vmax.f32 %v2355_v49, 0.0 }
 0x503   : > { %v3169_v44 = vpop.f32.mrf.mxu1 }
 0x504   : > { %v2358_v47 = vadd.f32 %v3169_v44, %v3986_v34  ;;  %v2461_v50 = vmax.f32 %v2347_v45, 0.0 }
 0x505   : > { %v2349_v46 = vpop.f32.mrf.mxu1 }
 0x506   : > { %v2350_v48 = vadd.f32 %v3986_v34, %v2349_v46  ;;  %v2464_v52 = vmax.f32 %v2358_v47, 0.0 }
 0x508   : > { %v2462_v51 = vmax.f32 %v2350_v48, 0.0  ;;  %v2492_v55 = vpack.c.bf16 %v2464_v52, %v2463_v54 }
 0x50a   : > { %v2491_v53 = vpack.c.bf16 %v2462_v51, %v2461_v50 }
 0x50c   : > { %2507 = vxpose.xlu1.c.b16.cont [3/8] (narrow) %v2491_v53, 32 }
 0x50f   : > { %v3172_v56 = vpop.f32.mrf.mxu1 }
 0x510   : > { %2508 = vxpose.xlu1.c.b16.cont [4/8] (narrow) %v2492_v55, 32  ;;  %v2371_v63 = vadd.f32 %v3172_v56, %v3986_v34 }
 0x511   : > { %v2362_v57 = vpop.f32.mrf.mxu1 }
 0x512   : > { %v2363_v59 = vadd.f32 %v3986_v34, %v2362_v57  ;;  %v2467_v4 = vmax.f32 %v2371_v63, 0.0 }
 0x513   : > { %v3173_v58 = vpop.f32.mrf.mxu1 }
 0x514   : > { %v2374_v61 = vadd.f32 %v3173_v58, %v3986_v34  ;;  %v2465_v0 = vmax.f32 %v2363_v59, 0.0 }
 0x515   : > { %v2365_v60 = vpop.f32.mrf.mxu1 }
 0x516   : > { %v2366_v62 = vadd.f32 %v3986_v34, %v2365_v60  ;;  %v2468_v2 = vmax.f32 %v2374_v61, 0.0 }
 0x518   : > { %v2466_v1 = vmax.f32 %v2366_v62, 0.0  ;;  %v2494_v5 = vpack.c.bf16 %v2468_v2, %v2467_v4 }
 0x51a   : > { %v2493_v3 = vpack.c.bf16 %v2466_v1, %v2465_v0 }
 0x51c   : > { %2509 = vxpose.xlu1.c.b16.cont [5/8] (narrow) %v2493_v3, 32 }
 0x51f   : > { %v3176_v6 = vpop.f32.mrf.mxu1 }
 0x520   : > { %2510 = vxpose.xlu1.c.b16.cont [6/8] (narrow) %v2494_v5, 32  ;;  %v2387_v13 = vadd.f32 %v3176_v6, %v3986_v34 }
 0x521   : > { %v2378_v7 = vpop.f32.mrf.mxu1 }
 0x522   : > { %v2379_v9 = vadd.f32 %v3986_v34, %v2378_v7  ;;  %v2471_v18 = vmax.f32 %v2387_v13, 0.0 }
 0x523   : > { %v3177_v8 = vpop.f32.mrf.mxu1 }
 0x524   : > { %v2390_v11 = vadd.f32 %v3177_v8, %v3986_v34  ;;  %v2469_v14 = vmax.f32 %v2379_v9, 0.0 }
 0x525   : > { %v2381_v10 = vpop.f32.mrf.mxu1 }
 0x526   : > { %v2382_v12 = vadd.f32 %v3986_v34, %v2381_v10  ;;  %v2472_v16 = vmax.f32 %v2390_v11, 0.0 }
 0x528   : > { %v2470_v15 = vmax.f32 %v2382_v12, 0.0  ;;  %v2496_v19 = vpack.c.bf16 %v2472_v16, %v2471_v18  ;;  %v2562_v16 = vpop.permute.xlu1 %2561  ;;  %v2552_v18 = vpop.permute.xlu0 %2551 }
 0x52a   : > { %v2495_v17 = vpack.c.bf16 %v2470_v15, %v2469_v14 }
 0x52c   : > { %2511 = vxpose.xlu1.c.b16.cont [7/8] (narrow) %v2495_v17, 32  ;;  %v2567_v17 = vpop.permute.xlu1 %2566 }
 0x52f   : > { %v3180_v20 = vpop.f32.mrf.mxu1 }
 0x530   : > { %2512 = vxpose.xlu1.c.b16.end [8/8] (narrow) %v2496_v19, 32  ;;  %v2403_v28 = vadd.f32 %v3180_v20, %v3986_v34 }
 0x531   : > { %v2394_v21 = vpop.f32.mrf.mxu1 }
 0x532   : > { %v2395_v23 = vadd.f32 %v3986_v34, %v2394_v21  ;;  %v2475_v35 = vmax.f32 %v2403_v28, 0.0 }
 0x533   : > { %v3181_v22 = vpop.f32.mrf.mxu1 }
 0x534   : > { %v2406_v39 = vadd.f32 %v3181_v22, %v3986_v34  ;;  %v2473_v29 = vmax.f32 %v2395_v23, 0.0  ;;  %v2557_v22 = vpop.permute.xlu0 %2556 }
 0x535   : > { %v2397_v24 = vpop.f32.mrf.mxu1 }
 0x536   : > { %v2398_v26 = vadd.f32 %v3986_v34, %v2397_v24  ;;  %v2476_v25 = vmax.f32 %v2406_v39, 0.0 }
 0x538   : > { %v2474_v32 = vmax.f32 %v2398_v26, 0.0  ;;  %v2498_v36 = vpack.c.bf16 %v2476_v25, %v2475_v35 }
 0x53a   : > { %v2497_v27 = vpack.c.bf16 %v2474_v32, %v2473_v29 }
 0x53c   : > { %2521 = vxpose.xlu0.c.b16.start [1/8] (narrow) %v2497_v27, 32  ;;  %v2599_v27 = vpop.permute.xlu0 %2598 }
 0x53f   : > { %v3184_v37 = vpop.f32.mrf.mxu1 }
 0x540   : > { %2522 = vxpose.xlu0.c.b16.cont [2/8] (narrow) %v2498_v36, 32  ;;  %v2419_v45 = vadd.f32 %v3184_v37, %v3986_v34 }
 0x541   : > { %v2410_v38 = vpop.f32.mrf.mxu1 }
 0x542   : > { %v2411_v41 = vadd.f32 %v3986_v34, %v2410_v38  ;;  %v2479_v50 = vmax.f32 %v2419_v45, 0.0 }
 0x543   : > { %v3185_v40 = vpop.f32.mrf.mxu1 }
 0x544   : > { %v2422_v43 = vadd.f32 %v3185_v40, %v3986_v34  ;;  %v2477_v46 = vmax.f32 %v2411_v41, 0.0 }
 0x545   : > { %v2413_v42 = vpop.f32.mrf.mxu1 }
 0x546   : > { %v2414_v44 = vadd.f32 %v3986_v34, %v2413_v42  ;;  %v2480_v48 = vmax.f32 %v2422_v43, 0.0 }
 0x548   : > { %v2478_v47 = vmax.f32 %v2414_v44, 0.0  ;;  %v2500_v51 = vpack.c.bf16 %v2480_v48, %v2479_v50 }
 0x54a   : > { %v2499_v49 = vpack.c.bf16 %v2478_v47, %v2477_v46 }
 0x54c   : > { %2523 = vxpose.xlu0.c.b16.cont [3/8] (narrow) %v2499_v49, 32 }
 0x54f   : > { %v3188_v52 = vpop.f32.mrf.mxu1 }
 0x550   : > { %2524 = vxpose.xlu0.c.b16.cont [4/8] (narrow) %v2500_v51, 32  ;;  %v2435_v59 = vadd.f32 %v3188_v52, %v3986_v34 }
 0x551   : > { %v2426_v53 = vpop.f32.mrf.mxu1 }
 0x552   : > { %v2427_v55 = vadd.f32 %v3986_v34, %v2426_v53  ;;  %v2483_v0 = vmax.f32 %v2435_v59, 0.0 }
 0x553   : > { %v3189_v54 = vpop.f32.mrf.mxu1 }
 0x554   : > { %v2438_v57 = vadd.f32 %v3189_v54, %v3986_v34  ;;  %v2481_v60 = vmax.f32 %v2427_v55, 0.0 }
 0x555   : > { %v2429_v56 = vpop.f32.mrf.mxu1 }
 0x556   : > { %v2430_v58 = vadd.f32 %v3986_v34, %v2429_v56  ;;  %v2484_v62 = vmax.f32 %v2438_v57, 0.0 }
 0x558   : > { %v2482_v61 = vmax.f32 %v2430_v58, 0.0  ;;  %v2502_v1 = vpack.c.bf16 %v2484_v62, %v2483_v0  ;;  %v3374_v58 = vmov 1966171168   ;;  %v2604_v62 = vrot.slane %v2599_v27, %v1208_v33 }
 0x559   : > { %v2611_v59 = vunpack.c.l.s4 %v3374_v58 }
 0x55a   : > { %v2501_v63 = vpack.c.bf16 %v2482_v61, %v2481_v60 }
 0x55b   : > { %v2612_v0 = vunpack.c.0.s8 %v2611_v59 }
 0x55c   : > { %2525 = vxpose.xlu0.c.b16.cont [5/8] (narrow) %v2501_v63, 32 }
 0x55f   : > { %v3192_v2 = vpop.f32.mrf.mxu1 }
 0x560   : > { %2526 = vxpose.xlu0.c.b16.cont [6/8] (narrow) %v2502_v1, 32  ;;  %v2451_v9 = vadd.f32 %v3192_v2, %v3986_v34 }
 0x561   : > { %v2442_v3 = vpop.f32.mrf.mxu1 }
 0x562   : > { %v2443_v5 = vadd.f32 %v3986_v34, %v2442_v3  ;;  %v2487_v14 = vmax.f32 %v2451_v9, 0.0 }
 0x563   : > { %v3193_v4 = vpop.f32.mrf.mxu1 }
 0x564   : > { %v2454_v7 = vadd.f32 %v3193_v4, %v3986_v34  ;;  %v2485_v10 = vmax.f32 %v2443_v5, 0.0  ;;  %v2615_v4 = vsub.s32 %v2612_v0, %v3768_v31 }
 0x565   : > { %v2445_v6 = vpop.f32.mrf.mxu1 }
 0x566   : > { %v2446_v8 = vadd.f32 %v3986_v34, %v2445_v6  ;;  %v2488_v12 = vmax.f32 %v2454_v7, 0.0 }
 0x568   : > { %v2486_v11 = vmax.f32 %v2446_v8, 0.0  ;;  %v2504_v15 = vpack.c.bf16 %v2488_v12, %v2487_v14 }
 0x56a   : > { %v2503_v13 = vpack.c.bf16 %v2486_v11, %v2485_v10 }
 0x56c   : > { %2527 = vxpose.xlu0.c.b16.cont [7/8] (narrow) %v2503_v13, 32 }
 0x570   : > { %2528 = vxpose.xlu0.c.b16.end [8/8] (narrow) %v2504_v15, 32 }
 0x576   : > { %v2513_v19 = vpop.trf.xlu1 }
 0x577   : > { %v2537_v20 = vunpack.c.l.bf16 %v2513_v19  ;;  %v2539_v21 = vunpack.c.h.bf16 %v2513_v19 }
 0x579   : > { %v2569_v24 = vmul.f32 %v2552_v18, %v2537_v20  ;;  %v2571_v39 = vmul.f32 %v2557_v22, %v2539_v21 }
 0x57a   : > { %v2514_v23 = vpop.trf.xlu1 }
 0x57b   : > { %v2541_v26 = vunpack.c.l.bf16 %v2514_v23  ;;  %v2577_v34 = vadd.f32 %v2571_v39, %v2569_v24  ;;  %v2543_v28 = vunpack.c.h.bf16 %v2514_v23 }
 0x57d   : > { %v2573_v29 = vmul.f32 %v2562_v16, %v2541_v26  ;;  %v2575_v32 = vmul.f32 %v2567_v17, %v2543_v28 }
 0x57f   : > { %v2578_v25 = vadd.f32 %v2577_v34, %v2573_v29 }
 0x581   : > { %v2579_v35 = vadd.f32 %v2578_v25, %v2575_v32 }
 0x583   : > { %v2580_v37 = vrot.slane %v2579_v35, 4 }
 0x585   : > { %v2581_v44 = vadd.f32 %v2580_v37, %v2579_v35 }
 0x587   : > { %v2582_v49 = vrot.slane %v2581_v44, 2 }
 0x589   : > { %v2583_v53 = vadd.f32 %v2582_v49, %v2581_v44 }
 0x58b   : > { %v2584_v56 = vrot.slane %v2583_v53, 1 }
 0x58d   : > { %v2585_v61 = vadd.f32 %v2584_v56, %v2583_v53 }
 0x58f   : > { %v2605_v2 = vadd.f32 %v2604_v62, %v2585_v61 }
 0x5b6   : > { %v2529_v36 = vpop.trf.xlu0 }
 0x5b7   : > { %v2538_v38 = vunpack.c.l.bf16 %v2529_v36  ;;  %v2540_v40 = vunpack.c.h.bf16 %v2529_v36 }
 0x5b9   : > { %v2570_v41 = vmul.f32 %v2552_v18, %v2538_v38  ;;  %v2572_v42 = vmul.f32 %v2557_v22, %v2540_v40 }
 0x5ba   : > { %v2530_v43 = vpop.trf.xlu0 }
 0x5bb   : > { %v2542_v45 = vunpack.c.l.bf16 %v2530_v43  ;;  %v2544_v46 = vunpack.c.h.bf16 %v2530_v43  ;;  %v2586_v47 = vadd.f32 %v2572_v42, %v2570_v41 }
 0x5bd   : > { %v2574_v48 = vmul.f32 %v2562_v16, %v2542_v45  ;;  %v2576_v50 = vmul.f32 %v2567_v17, %v2544_v46 }
 0x5bf   : > { %v2587_v51 = vadd.f32 %v2586_v47, %v2574_v48 }
 0x5c1   : > { %v2588_v52 = vadd.f32 %v2587_v51, %v2576_v50 }
 0x5c3   : > { %v2589_v54 = vrot.slane %v2588_v52, 4 }
 0x5c5   : > { %v2590_v55 = vadd.f32 %v2589_v54, %v2588_v52 }
 0x5c7   : > { %v2591_v57 = vrot.slane %v2590_v55, 2 }
 0x5c9   : > { %v2592_v60 = vadd.f32 %v2591_v57, %v2590_v55 }
 0x5cb   : > { %v2593_v63 = vrot.slane %v2592_v60, 1 }
 0x5cd   : > { %v2594_v1 = vadd.f32 %v2593_v63, %v2592_v60 }
 0x5cf   : > { %v2606_v3 = vadd.f32 %v2604_v62, %v2594_v1 }
 0x5d1   : > { %v2609_v5 = vcombine.low %v2605_v2, %v2606_v3 }
 0x5d3   : > { %v2616_v6 = vrot.slane %v2609_v5, %v2615_v4 }
 0x5d5   : > { %v2623_v7 = vrot.slane %v2616_v6, %v2615_v4 }
 0x5d7   : > { %2629 = vst.msk [vmem:[%s490_s22] sm:$0x3] %vm2627_vm2, %v2623_v7 }
 0x5d8   : > { %3324 = shalt.err (!%p3321_p3)
}
 0x5d9   : > { %s3325_s2 = scalar_lea.hbm %s2643_s28, 32  ;;  %s3329_s22 = scalar_lea.hbm %s4073_s15, 64 }
 0x5da   : > { %p3326_p4 = scmp.ne.s32.totalorder %s2643_s28, %s3325_s2  ;;  %p3330_p9 = scmp.lt.s32.totalorder %s2643_s28, %s4073_s15 }
 0x5db   : > { %p3331_p10 = scmp.lt.s32.totalorder %s3329_s22, %s3325_s2 }
 0x5dc   : > { %p3327_p7 = pnand %p3326_p4, %p3494_p5 }
 0x5dd   : > { %p3332_p11 = por %p3331_p10, %p3330_p9 }
 0x5de   : > { %p3328_p8 = pneg %p3327_p7 }
 0x5e0   : > { %p3333_p12 = pnand %p3332_p11, %p3328_p8 }
 0x5e2   : > { %3336 = shalt.err (!%p3333_p12)
}
 0x5e3   : > { %3194 = dma.vmem_to_hbm [thread:$0]  (%p3494_p5), %s2646_s14, 32, %s2643_s28, %s2631_s19  }
 0x5e4 PF: > { %p3200_p13 = scmp.ge.s32.totalorder %s3371_s23, 2  ;;  %s2657_s1 = sand.u32 1, %s3359_s20  }
 0x5e5   : > { %s2658_s24 = scalar_lea.sflag [#allocation4], %s2657_s1 }
 0x5e6   : > { %p3197_p0 = pnand %p3200_p13, %p3498_p6 }
 0x5e8   : > { %p3198_p1 = pneg %p3197_p0 }
 0x5ea   : > { %3354 = dma.done.wait (%p3198_p1), %s2658_s24, 32  }
 0x5eb   : > { %3356 = vsyncadd (%p3198_p1), %s2658_s24, 4294967264  ;;  %s4085_s2 = sld [smem:[#allocation6_spill]]  ;;  %p27_p2 = scmp.ge.s32.totalorder %s3482_s25, 4  }
 0x5ec   : > { %s4086_s22 = sld [smem:[#allocation7_spill]]  ;;  %s4087_s20 = smov %s3363_s21 }
 0x5ed   : > { %s4089_s23 = smov %s3482_s25  ;;  %29 = sbr.rel (!%p27_p2) target bundleno = 7 (0x7), region = 115 }
 0x5f1   : > { %s4088_s21 = smov %s4085_s2 }
 0x5f2   :  { %2663 = vsyncpa [#allocation4], 1 }
 0x5f3   :  { %2665 = vsyncpa [#allocation4 + $0x1], 1 }

</bundles_post_ra>
